<compile_context>
chip_gen: v7x
topology: tpu7x:2x2x1
jax: 0.10.0
libtpu: 0.0.40
codegen_flags: <defaults>
</compile_context>

<pallas_src>
import functools

import jax
import jax.numpy as jnp
import numpy as np
from jax.experimental import pallas as pl
from jax.experimental.pallas import tpu as pltpu

EPS = 1e-5  # torch.nn.LayerNorm default eps


def _layernorm(v, g, b):
    mu = jnp.mean(v, axis=-1, keepdims=True)
    var = jnp.mean((v - mu) ** 2, axis=-1, keepdims=True)
    return (v - mu) * jax.lax.rsqrt(var + EPS) * g + b


def diff_layer_kernel(x_ref, emb_ref, sdn_ref, sup_ref,
                      wc_ref, bc_ref, g1_ref, b1_ref,
                      wqa_ref, wkv_ref, wo_ref, ga_ref, ba_ref,
                      wlb_ref, bl_ref, g2_ref, b2_ref,
                      o_ref, *, L, Bb, QKV):
    f32 = jnp.float32
    x = x_ref[...]      # (M, H)  Bb batch elements, rows are batch-major / seq-minor
    emb = emb_ref[...]  # (M, H)

    # --- Conv1d(H, H, kernel=3, padding=1): +-1 row shifts computed in-kernel --------
    # sdn/sup are 0/1 shift matrices that also zero the per-batch boundary rows.
    xp = jnp.dot(sdn_ref[...], x, preferred_element_type=f32)   # xp[r] = x[r-1], 0 at l==0
    xn = jnp.dot(sup_ref[...], x, preferred_element_type=f32)   # xn[r] = x[r+1], 0 at l==L-1
    y = (jnp.dot(xp, wc_ref[0], preferred_element_type=f32)
         + jnp.dot(x, wc_ref[1], preferred_element_type=f32)
         + jnp.dot(xn, wc_ref[2], preferred_element_type=f32)
         + bc_ref[...])

    # --- x = norm1(relu(conv(x))) ------------------------------------------------------
    x1 = _layernorm(jnp.maximum(y, 0.0), g1_ref[...], b1_ref[...])        # (M, H)

    # --- fused shared-LHS projections:  x1 @ [wq | wla],  emb @ [wk | wv] ---------------
    r1 = jnp.dot(x1, wqa_ref[...], preferred_element_type=f32)            # (M, QKV + H)
    q = r1[:, :QKV]                                                       # x1 @ wq
    xza = r1[:, QKV:]                                                     # x1 @ wla
    r2 = jnp.dot(emb, wkv_ref[...], preferred_element_type=f32)           # (M, 2*QKV)
    k = r2[:, :QKV]
    v = r2[:, QKV:]

    scale = 1.0 / jnp.sqrt(jnp.float32(L))
    wo = wo_ref[...]
    wlb = wlb_ref[...]

    # Attention ((QKV, QKV) scores) is per batch element -> static unrolled loop.
    for b in range(Bb):
        rows = slice(b * L, (b + 1) * L)
        qb, kb, vb, embb = q[rows], k[rows], v[rows], emb[rows]

        # torch SDPA on transposed tensors: softmax over the QKV axis, scale 1/sqrt(L).
        # scores[i, j] = sum_l qb[l, i] * kb[l, j]
        scores = jax.lax.dot_general(qb, kb, (((0,), (0,)), ((), ())),
                                     preferred_element_type=f32) * scale   # (QKV, QKV)
        m = jnp.max(scores, axis=-1, keepdims=True)
        p = jnp.exp(scores - m)
        attn = p * pl.reciprocal(jnp.sum(p, axis=-1, keepdims=True), approx=True)
        # ctx[l, i] = sum_j attn[i, j] * vb[l, j]   (== (attn @ vb^T)^T)
        ctx = jax.lax.dot_general(vb, attn, (((1,), (1,)), ((), ())),
                                  preferred_element_type=f32)              # (L, QKV)

        # --- extracted_emb = ln_attn(embeddings + proj_out(context)) --------------------
        extracted = _layernorm(
            embb + jnp.dot(ctx, wo, preferred_element_type=f32),
            ga_ref[...], ba_ref[...])

        # --- linear(cat([x_orig, extracted], -1)) == x1 @ wla + extracted @ wlb + bl ----
        z = xza[rows] + jnp.dot(extracted, wlb, preferred_element_type=f32) + bl_ref[...]
        outb = _layernorm(jnp.maximum(z, 0.0), g2_ref[...], b2_ref[...])
        # TODO(synk): Dropout(0.1) is train-mode randomness; identity here (eval mode).
        o_ref[pl.ds(b * L, L), :] = outb.astype(o_ref.dtype)


def diff_layer(x, emb, params):
    B, L, H = x.shape
    QKV = params["wq"].shape[1]

    # Fold batch rows into the matmul M dimension; keep >= 2 grid steps when possible
    # so both v7x TensorCores get work under dimension_semantics=("parallel",).
    Bb = B // 2 if (B % 2 == 0 and B >= 2) else 1
    M = Bb * L

    # Tiny 0/1 shift matrices: xp = sdown @ x, xn = sup @ x.  They zero-fill the
    # sequence edges and never mix rows across batch elements within a block.
    sdown = np.zeros((M, M), np.float32)
    sup = np.zeros((M, M), np.float32)
    for r in range(M):
        if r % L != 0:
            sdown[r, r - 1] = 1.0
        if r % L != L - 1:
            sup[r, r + 1] = 1.0
    sdown = jnp.asarray(sdown)
    sup = jnp.asarray(sup)

    # Shared-LHS weight fusion (done once here; sliced lane-aligned inside the kernel).
    wqa = jnp.concatenate([params["wq"], params["wla"]], axis=1)    # (H, QKV + H)
    wkv = jnp.concatenate([params["wk"], params["wv"]], axis=1)     # (H, 2 * QKV)

    # Row-flattened activations: (B, L, H) -> (B*L, H); metadata-only reshape, no copy.
    x2 = x.reshape(B * L, H)
    emb2 = emb.reshape(B * L, H)

    weights = [sdown, sup, params["wc"], params["bc"], params["g1"], params["b1"],
               wqa, wkv, params["wo"], params["ga"], params["ba"],
               params["wlb"], params["bl"], params["g2"], params["b2"]]

    def full_spec(a):
        nd = a.ndim
        return pl.BlockSpec(a.shape, lambda i, nd=nd: (0,) * nd)

    row_spec = pl.BlockSpec((M, H), lambda i: (i, 0))
    kernel = functools.partial(diff_layer_kernel, L=L, Bb=Bb, QKV=QKV)

    # TODO(synk): at production sizes (H~1024, rank=16) add vmem_limit_bytes and
    # pipeline_mode=pl.Buffered(1) on the constant-index weight specs so weight
    # double-buffering does not blow v7x's 64 MiB VMEM.
    out = pl.pallas_call(
        kernel,
        out_shape=jax.ShapeDtypeStruct((B * L, H), x.dtype),
        grid_spec=pltpu.PrefetchScalarGridSpec(
            num_scalar_prefetch=0,
            grid=(B // Bb,),
            in_specs=[row_spec, row_spec] + [full_spec(w) for w in weights],
            out_specs=pl.BlockSpec((M, H), lambda i: (i, 0)),
        ),
        compiler_params=pltpu.CompilerParams(dimension_semantics=("parallel",)),
    )(x2, emb2, *weights)
    return out.reshape(B, L, H)


def reference(x, emb, p):
    """Pure-JAX reference matching the PyTorch forward (attn_impl='flash', eval)."""
    B, L, H = x.shape
    zeros = jnp.zeros((B, 1, H), x.dtype)
    xprev = jnp.concatenate([zeros, x[:, :-1]], axis=1)
    xnext = jnp.concatenate([x[:, 1:], zeros], axis=1)
    y = (jnp.einsum('blh,hg->blg', xprev, p['wc'][0])
         + jnp.einsum('blh,hg->blg', x, p['wc'][1])
         + jnp.einsum('blh,hg->blg', xnext, p['wc'][2]) + p['bc'])

    def ln(v, g, b):
        mu = v.mean(-1, keepdims=True)
        var = ((v - mu) ** 2).mean(-1, keepdims=True)
        return (v - mu) / jnp.sqrt(var + EPS) * g + b

    x1 = ln(jnp.maximum(y, 0.0), p['g1'], p['b1'])
    q = x1 @ p['wq']
    k = emb @ p['wk']
    v = emb @ p['wv']
    scores = jnp.einsum('blq,blk->bqk', q, k) / jnp.sqrt(jnp.float32(L))
    attn = jax.nn.softmax(scores, axis=-1)
    ctx = jnp.einsum('bqk,blk->blq', attn, v)
    extracted = ln(emb + ctx @ p['wo'], p['ga'], p['ba'])
    z = x1 @ p['wla'] + extracted @ p['wlb'] + p['bl']
    return ln(jnp.maximum(z, 0.0), p['g2'], p['b2'])


if __name__ == "__main__":
    B, L, H, RANK = 4, 8, 32, 4
    QKV = RANK * H  # 128

    key = jax.random.PRNGKey(0)
    ks = jax.random.split(key, 12)
    s = 0.05
    params = {
        # conv weight stored as (k, in, out): wc[k, i, o] == torch_conv.weight[o, i, k]
        "wc": jax.random.normal(ks[0], (3, H, H), jnp.float32) * s,
        "bc": jax.random.normal(ks[1], (1, H), jnp.float32) * s,
        "g1": jnp.ones((1, H), jnp.float32),
        "b1": jnp.zeros((1, H), jnp.float32),
        # Linear weights stored as (in, out): w == torch_linear.weight.T
        "wq": jax.random.normal(ks[2], (H, QKV), jnp.float32) * s,
        "wk": jax.random.normal(ks[3], (H, QKV), jnp.float32) * s,
        "wv": jax.random.normal(ks[4], (H, QKV), jnp.float32) * s,
        "wo": jax.random.normal(ks[5], (QKV, H), jnp.float32) * s,
        "ga": jnp.ones((1, H), jnp.float32),
        "ba": jnp.zeros((1, H), jnp.float32),
        # linear(2H -> H) split into the x_orig half and the extracted_emb half
        "wla": jax.random.normal(ks[6], (H, H), jnp.float32) * s,
        "wlb": jax.random.normal(ks[7], (H, H), jnp.float32) * s,
        "bl": jax.random.normal(ks[8], (1, H), jnp.float32) * s,
        "g2": jnp.ones((1, H), jnp.float32),
        "b2": jnp.zeros((1, H), jnp.float32),
    }

    x = jax.random.normal(ks[9], (B, L, H), jnp.float32)
    emb = jax.random.normal(ks[10], (B, L, H), jnp.float32)

    out = diff_layer(x, emb, params)
    out = jax.block_until_ready(out)

    ref = reference(x, emb, params)
    np.testing.assert_allclose(np.asarray(out), np.asarray(ref), rtol=2e-2, atol=2e-2)
    print("KERNEL_OK")
</pallas_src>

<mosaic_0001>
module attributes {stable_mosaic.version = 11 : i64} {
  func.func @diff_layer_kernel(%arg0: i32, %arg1: memref<16x32xf32, #tpu.memory_space<vmem>>, %arg2: memref<16x32xf32, #tpu.memory_space<vmem>>, %arg3: memref<16x16xf32, #tpu.memory_space<vmem>>, %arg4: memref<16x16xf32, #tpu.memory_space<vmem>>, %arg5: memref<3x32x32xf32, #tpu.memory_space<vmem>>, %arg6: memref<1x32xf32, #tpu.memory_space<vmem>>, %arg7: memref<1x32xf32, #tpu.memory_space<vmem>>, %arg8: memref<1x32xf32, #tpu.memory_space<vmem>>, %arg9: memref<32x160xf32, #tpu.memory_space<vmem>>, %arg10: memref<32x256xf32, #tpu.memory_space<vmem>>, %arg11: memref<128x32xf32, #tpu.memory_space<vmem>>, %arg12: memref<1x32xf32, #tpu.memory_space<vmem>>, %arg13: memref<1x32xf32, #tpu.memory_space<vmem>>, %arg14: memref<32x32xf32, #tpu.memory_space<vmem>>, %arg15: memref<1x32xf32, #tpu.memory_space<vmem>>, %arg16: memref<1x32xf32, #tpu.memory_space<vmem>>, %arg17: memref<1x32xf32, #tpu.memory_space<vmem>>, %arg18: memref<16x32xf32, #tpu.memory_space<vmem>>) attributes {dimension_semantics = [#tpu.dimension_semantics<parallel>], iteration_bounds = array<i64: 2>, scalar_prefetch = 0 : i64, scratch_operands = 0 : i64, tpu.core_type = #tpu.core_type<tc>, window_params = [{transform_indices = @transform_0, window_bounds = array<i64: 16, 32>}, {transform_indices = @transform_1, window_bounds = array<i64: 16, 32>}, {pipeline_mode = #tpu.pipeline_mode<synchronous>, transform_indices = @transform_2, window_bounds = array<i64: 16, 16>}, {pipeline_mode = #tpu.pipeline_mode<synchronous>, transform_indices = @transform_3, window_bounds = array<i64: 16, 16>}, {pipeline_mode = #tpu.pipeline_mode<synchronous>, transform_indices = @transform_4, window_bounds = array<i64: 3, 32, 32>}, {pipeline_mode = #tpu.pipeline_mode<synchronous>, transform_indices = @transform_5, window_bounds = array<i64: 1, 32>}, {pipeline_mode = #tpu.pipeline_mode<synchronous>, transform_indices = @transform_6, window_bounds = array<i64: 1, 32>}, {pipeline_mode = #tpu.pipeline_mode<synchronous>, transform_indices = @transform_7, window_bounds = array<i64: 1, 32>}, {pipeline_mode = #tpu.pipeline_mode<synchronous>, transform_indices = @transform_8, window_bounds = array<i64: 32, 160>}, {pipeline_mode = #tpu.pipeline_mode<synchronous>, transform_indices = @transform_9, window_bounds = array<i64: 32, 256>}, {pipeline_mode = #tpu.pipeline_mode<synchronous>, transform_indices = @transform_10, window_bounds = array<i64: 128, 32>}, {pipeline_mode = #tpu.pipeline_mode<synchronous>, transform_indices = @transform_11, window_bounds = array<i64: 1, 32>}, {pipeline_mode = #tpu.pipeline_mode<synchronous>, transform_indices = @transform_12, window_bounds = array<i64: 1, 32>}, {pipeline_mode = #tpu.pipeline_mode<synchronous>, transform_indices = @transform_13, window_bounds = array<i64: 32, 32>}, {pipeline_mode = #tpu.pipeline_mode<synchronous>, transform_indices = @transform_14, window_bounds = array<i64: 1, 32>}, {pipeline_mode = #tpu.pipeline_mode<synchronous>, transform_indices = @transform_15, window_bounds = array<i64: 1, 32>}, {pipeline_mode = #tpu.pipeline_mode<synchronous>, transform_indices = @transform_16, window_bounds = array<i64: 1, 32>}, {transform_indices = @transform_17, window_bounds = array<i64: 16, 32>}]} {
    %c0 = arith.constant 0 : index
    %c0_0 = arith.constant 0 : index
    %0 = vector.load %arg1[%c0, %c0_0] : memref<16x32xf32, #tpu.memory_space<vmem>>, vector<16x32xf32>
    %c0_1 = arith.constant 0 : index
    %c0_2 = arith.constant 0 : index
    %1 = vector.load %arg2[%c0_1, %c0_2] : memref<16x32xf32, #tpu.memory_space<vmem>>, vector<16x32xf32>
    %c0_3 = arith.constant 0 : index
    %c0_4 = arith.constant 0 : index
    %2 = vector.load %arg3[%c0_3, %c0_4] : memref<16x16xf32, #tpu.memory_space<vmem>>, vector<16x16xf32>
    %cst = arith.constant dense<0.000000e+00> : vector<16x32xf32>
    %3 = tpu.matmul %2, %0, %cst {dimension_numbers = #tpu.dot_dimension_numbers<[1], [0], [0], [1], [0, 0, 1, 1], [], []>} : vector<16x16xf32>, vector<16x32xf32>, vector<16x32xf32> -> vector<16x32xf32>
    %c0_5 = arith.constant 0 : index
    %c0_6 = arith.constant 0 : index
    %4 = vector.load %arg4[%c0_5, %c0_6] : memref<16x16xf32, #tpu.memory_space<vmem>>, vector<16x16xf32>
    %cst_7 = arith.constant dense<0.000000e+00> : vector<16x32xf32>
    %5 = tpu.matmul %4, %0, %cst_7 {dimension_numbers = #tpu.dot_dimension_numbers<[1], [0], [0], [1], [0, 0, 1, 1], [], []>} : vector<16x16xf32>, vector<16x32xf32>, vector<16x32xf32> -> vector<16x32xf32>
    %c0_8 = arith.constant 0 : index
    %c0_9 = arith.constant 0 : index
    %c0_10 = arith.constant 0 : index
    %6 = vector.load %arg5[%c0_8, %c0_9, %c0_10] : memref<3x32x32xf32, #tpu.memory_space<vmem>>, vector<1x32x32xf32>
    %7 = vector.shape_cast %6 : vector<1x32x32xf32> to vector<32x32xf32>
    %cst_11 = arith.constant dense<0.000000e+00> : vector<16x32xf32>
    %8 = tpu.matmul %3, %7, %cst_11 {dimension_numbers = #tpu.dot_dimension_numbers<[1], [0], [0], [1], [0, 0, 1, 1], [], []>} : vector<16x32xf32>, vector<32x32xf32>, vector<16x32xf32> -> vector<16x32xf32>
    %c1 = arith.constant 1 : index
    %c0_12 = arith.constant 0 : index
    %c0_13 = arith.constant 0 : index
    %9 = vector.load %arg5[%c1, %c0_12, %c0_13] : memref<3x32x32xf32, #tpu.memory_space<vmem>>, vector<1x32x32xf32>
    %10 = vector.shape_cast %9 : vector<1x32x32xf32> to vector<32x32xf32>
    %cst_14 = arith.constant dense<0.000000e+00> : vector<16x32xf32>
    %11 = tpu.matmul %0, %10, %cst_14 {dimension_numbers = #tpu.dot_dimension_numbers<[1], [0], [0], [1], [0, 0, 1, 1], [], []>} : vector<16x32xf32>, vector<32x32xf32>, vector<16x32xf32> -> vector<16x32xf32>
    %12 = arith.addf %8, %11 : vector<16x32xf32>
    %c2 = arith.constant 2 : index
    %c0_15 = arith.constant 0 : index
    %c0_16 = arith.constant 0 : index
    %13 = vector.load %arg5[%c2, %c0_15, %c0_16] : memref<3x32x32xf32, #tpu.memory_space<vmem>>, vector<1x32x32xf32>
    %14 = vector.shape_cast %13 : vector<1x32x32xf32> to vector<32x32xf32>
    %cst_17 = arith.constant dense<0.000000e+00> : vector<16x32xf32>
    %15 = tpu.matmul %5, %14, %cst_17 {dimension_numbers = #tpu.dot_dimension_numbers<[1], [0], [0], [1], [0, 0, 1, 1], [], []>} : vector<16x32xf32>, vector<32x32xf32>, vector<16x32xf32> -> vector<16x32xf32>
    %16 = arith.addf %12, %15 : vector<16x32xf32>
    %c0_18 = arith.constant 0 : index
    %c0_19 = arith.constant 0 : index
    %17 = vector.load %arg6[%c0_18, %c0_19] : memref<1x32xf32, #tpu.memory_space<vmem>>, vector<1x32xf32>
    %18 = vector.broadcast %17 : vector<1x32xf32> to vector<16x32xf32>
    %19 = arith.addf %16, %18 : vector<16x32xf32>
    %cst_20 = arith.constant 0.000000e+00 : f32
    %20 = vector.broadcast %cst_20 : f32 to vector<16x32xf32>
    %21 = arith.maximumf %19, %20 : vector<16x32xf32>
    %c0_21 = arith.constant 0 : index
    %c0_22 = arith.constant 0 : index
    %22 = vector.load %arg7[%c0_21, %c0_22] : memref<1x32xf32, #tpu.memory_space<vmem>>, vector<1x32xf32>
    %c0_23 = arith.constant 0 : index
    %c0_24 = arith.constant 0 : index
    %23 = vector.load %arg8[%c0_23, %c0_24] : memref<1x32xf32, #tpu.memory_space<vmem>>, vector<1x32xf32>
    %cst_25 = arith.constant dense<0.000000e+00> : vector<16xf32>
    %24 = vector.multi_reduction <add>, %21, %cst_25 [1] : vector<16x32xf32> to vector<16xf32>
    %25 = vector.shape_cast %24 : vector<16xf32> to vector<16x1xf32>
    %cst_26 = arith.constant 3.200000e+01 : f32
    %26 = vector.broadcast %cst_26 : f32 to vector<16x1xf32>
    %27 = arith.divf %25, %26 : vector<16x1xf32>
    %28 = vector.broadcast %27 : vector<16x1xf32> to vector<16x32xf32>
    %29 = arith.subf %21, %28 : vector<16x32xf32>
    %30 = arith.mulf %29, %29 : vector<16x32xf32>
    %cst_27 = arith.constant dense<0.000000e+00> : vector<16xf32>
    %31 = vector.multi_reduction <add>, %30, %cst_27 [1] : vector<16x32xf32> to vector<16xf32>
    %32 = vector.shape_cast %31 : vector<16xf32> to vector<16x1xf32>
    %cst_28 = arith.constant 3.200000e+01 : f32
    %33 = vector.broadcast %cst_28 : f32 to vector<16x1xf32>
    %34 = arith.divf %32, %33 : vector<16x1xf32>
    %35 = vector.broadcast %27 : vector<16x1xf32> to vector<16x32xf32>
    %36 = arith.subf %21, %35 : vector<16x32xf32>
    %cst_29 = arith.constant 9.99999974E-6 : f32
    %37 = vector.broadcast %cst_29 : f32 to vector<16x1xf32>
    %38 = arith.addf %34, %37 : vector<16x1xf32>
    %39 = math.rsqrt %38 : vector<16x1xf32>
    %40 = vector.broadcast %39 : vector<16x1xf32> to vector<16x32xf32>
    %41 = arith.mulf %36, %40 : vector<16x32xf32>
    %42 = vector.broadcast %22 : vector<1x32xf32> to vector<16x32xf32>
    %43 = arith.mulf %41, %42 : vector<16x32xf32>
    %44 = vector.broadcast %23 : vector<1x32xf32> to vector<16x32xf32>
    %45 = arith.addf %43, %44 : vector<16x32xf32>
    %c0_30 = arith.constant 0 : index
    %c0_31 = arith.constant 0 : index
    %46 = vector.load %arg9[%c0_30, %c0_31] : memref<32x160xf32, #tpu.memory_space<vmem>>, vector<32x160xf32>
    %cst_32 = arith.constant dense<0.000000e+00> : vector<16x160xf32>
    %47 = tpu.matmul %45, %46, %cst_32 {dimension_numbers = #tpu.dot_dimension_numbers<[1], [0], [0], [1], [0, 0, 1, 1], [], []>} : vector<16x32xf32>, vector<32x160xf32>, vector<16x160xf32> -> vector<16x160xf32>
    %48 = vector.extract_strided_slice %47 {offsets = [0, 0], sizes = [16, 128], strides = [1, 1]} : vector<16x160xf32> to vector<16x128xf32>
    %49 = vector.extract_strided_slice %47 {offsets = [0, 128], sizes = [16, 32], strides = [1, 1]} : vector<16x160xf32> to vector<16x32xf32>
    %c0_33 = arith.constant 0 : index
    %c0_34 = arith.constant 0 : index
    %50 = vector.load %arg10[%c0_33, %c0_34] : memref<32x256xf32, #tpu.memory_space<vmem>>, vector<32x256xf32>
    %cst_35 = arith.constant dense<0.000000e+00> : vector<16x256xf32>
    %51 = tpu.matmul %1, %50, %cst_35 {dimension_numbers = #tpu.dot_dimension_numbers<[1], [0], [0], [1], [0, 0, 1, 1], [], []>} : vector<16x32xf32>, vector<32x256xf32>, vector<16x256xf32> -> vector<16x256xf32>
    %52 = vector.extract_strided_slice %51 {offsets = [0, 0], sizes = [16, 128], strides = [1, 1]} : vector<16x256xf32> to vector<16x128xf32>
    %53 = vector.extract_strided_slice %51 {offsets = [0, 128], sizes = [16, 128], strides = [1, 1]} : vector<16x256xf32> to vector<16x128xf32>
    %cst_36 = arith.constant 8.000000e+00 : f32
    %54 = math.sqrt %cst_36 : f32
    %cst_37 = arith.constant 1.000000e+00 : f32
    %55 = arith.divf %cst_37, %54 : f32
    %c0_38 = arith.constant 0 : index
    %c0_39 = arith.constant 0 : index
    %56 = vector.load %arg11[%c0_38, %c0_39] : memref<128x32xf32, #tpu.memory_space<vmem>>, vector<128x32xf32>
    %c0_40 = arith.constant 0 : index
    %c0_41 = arith.constant 0 : index
    %57 = vector.load %arg14[%c0_40, %c0_41] : memref<32x32xf32, #tpu.memory_space<vmem>>, vector<32x32xf32>
    %58 = vector.extract_strided_slice %48 {offsets = [0, 0], sizes = [8, 128], strides = [1, 1]} : vector<16x128xf32> to vector<8x128xf32>
    %59 = vector.extract_strided_slice %52 {offsets = [0, 0], sizes = [8, 128], strides = [1, 1]} : vector<16x128xf32> to vector<8x128xf32>
    %60 = vector.extract_strided_slice %53 {offsets = [0, 0], sizes = [8, 128], strides = [1, 1]} : vector<16x128xf32> to vector<8x128xf32>
    %61 = vector.extract_strided_slice %1 {offsets = [0, 0], sizes = [8, 32], strides = [1, 1]} : vector<16x32xf32> to vector<8x32xf32>
    %cst_42 = arith.constant dense<0.000000e+00> : vector<128x128xf32>
    %62 = tpu.matmul %58, %59, %cst_42 {dimension_numbers = #tpu.dot_dimension_numbers<[0], [0], [1], [1], [0, 1, 1, 1], [], []>} : vector<8x128xf32>, vector<8x128xf32>, vector<128x128xf32> -> vector<128x128xf32>
    %63 = vector.broadcast %55 : f32 to vector<128x128xf32>
    %64 = arith.mulf %62, %63 : vector<128x128xf32>
    %cst_43 = arith.constant dense<0xFF800000> : vector<128xf32>
    %65 = vector.multi_reduction <maximumf>, %64, %cst_43 [1] : vector<128x128xf32> to vector<128xf32>
    %66 = vector.shape_cast %65 : vector<128xf32> to vector<128x1xf32>
    %67 = vector.broadcast %66 : vector<128x1xf32> to vector<128x128xf32>
    %68 = arith.subf %64, %67 : vector<128x128xf32>
    %69 = math.exp %68 : vector<128x128xf32>
    %cst_44 = arith.constant dense<0.000000e+00> : vector<128xf32>
    %70 = vector.multi_reduction <add>, %69, %cst_44 [1] : vector<128x128xf32> to vector<128xf32>
    %71 = vector.shape_cast %70 : vector<128xf32> to vector<128x1xf32>
    %72 = tpu.reciprocal %71 {approx = true} : vector<128x1xf32> -> vector<128x1xf32>
    %73 = vector.broadcast %72 : vector<128x1xf32> to vector<128x128xf32>
    %74 = arith.mulf %69, %73 : vector<128x128xf32>
    %cst_45 = arith.constant dense<0.000000e+00> : vector<8x128xf32>
    %75 = tpu.matmul %60, %74, %cst_45 {dimension_numbers = #tpu.dot_dimension_numbers<[1], [1], [0], [0], [0, 0, 1, 0], [], []>} : vector<8x128xf32>, vector<128x128xf32>, vector<8x128xf32> -> vector<8x128xf32>
    %cst_46 = arith.constant dense<0.000000e+00> : vector<8x32xf32>
    %76 = tpu.matmul %75, %56, %cst_46 {dimension_numbers = #tpu.dot_dimension_numbers<[1], [0], [0], [1], [0, 0, 1, 1], [], []>} : vector<8x128xf32>, vector<128x32xf32>, vector<8x32xf32> -> vector<8x32xf32>
    %77 = arith.addf %61, %76 : vector<8x32xf32>
    %c0_47 = arith.constant 0 : index
    %c0_48 = arith.constant 0 : index
    %78 = vector.load %arg12[%c0_47, %c0_48] : memref<1x32xf32, #tpu.memory_space<vmem>>, vector<1x32xf32>
    %c0_49 = arith.constant 0 : index
    %c0_50 = arith.constant 0 : index
    %79 = vector.load %arg13[%c0_49, %c0_50] : memref<1x32xf32, #tpu.memory_space<vmem>>, vector<1x32xf32>
    %cst_51 = arith.constant dense<0.000000e+00> : vector<8xf32>
    %80 = vector.multi_reduction <add>, %77, %cst_51 [1] : vector<8x32xf32> to vector<8xf32>
    %81 = vector.shape_cast %80 : vector<8xf32> to vector<8x1xf32>
    %cst_52 = arith.constant 3.200000e+01 : f32
    %82 = vector.broadcast %cst_52 : f32 to vector<8x1xf32>
    %83 = arith.divf %81, %82 : vector<8x1xf32>
    %84 = vector.broadcast %83 : vector<8x1xf32> to vector<8x32xf32>
    %85 = arith.subf %77, %84 : vector<8x32xf32>
    %86 = arith.mulf %85, %85 : vector<8x32xf32>
    %cst_53 = arith.constant dense<0.000000e+00> : vector<8xf32>
    %87 = vector.multi_reduction <add>, %86, %cst_53 [1] : vector<8x32xf32> to vector<8xf32>
    %88 = vector.shape_cast %87 : vector<8xf32> to vector<8x1xf32>
    %cst_54 = arith.constant 3.200000e+01 : f32
    %89 = vector.broadcast %cst_54 : f32 to vector<8x1xf32>
    %90 = arith.divf %88, %89 : vector<8x1xf32>
    %91 = vector.broadcast %83 : vector<8x1xf32> to vector<8x32xf32>
    %92 = arith.subf %77, %91 : vector<8x32xf32>
    %cst_55 = arith.constant 9.99999974E-6 : f32
    %93 = vector.broadcast %cst_55 : f32 to vector<8x1xf32>
    %94 = arith.addf %90, %93 : vector<8x1xf32>
    %95 = math.rsqrt %94 : vector<8x1xf32>
    %96 = vector.broadcast %95 : vector<8x1xf32> to vector<8x32xf32>
    %97 = arith.mulf %92, %96 : vector<8x32xf32>
    %98 = vector.broadcast %78 : vector<1x32xf32> to vector<8x32xf32>
    %99 = arith.mulf %97, %98 : vector<8x32xf32>
    %100 = vector.broadcast %79 : vector<1x32xf32> to vector<8x32xf32>
    %101 = arith.addf %99, %100 : vector<8x32xf32>
    %102 = vector.extract_strided_slice %49 {offsets = [0, 0], sizes = [8, 32], strides = [1, 1]} : vector<16x32xf32> to vector<8x32xf32>
    %cst_56 = arith.constant dense<0.000000e+00> : vector<8x32xf32>
    %103 = tpu.matmul %101, %57, %cst_56 {dimension_numbers = #tpu.dot_dimension_numbers<[1], [0], [0], [1], [0, 0, 1, 1], [], []>} : vector<8x32xf32>, vector<32x32xf32>, vector<8x32xf32> -> vector<8x32xf32>
    %104 = arith.addf %102, %103 : vector<8x32xf32>
    %c0_57 = arith.constant 0 : index
    %c0_58 = arith.constant 0 : index
    %105 = vector.load %arg15[%c0_57, %c0_58] : memref<1x32xf32, #tpu.memory_space<vmem>>, vector<1x32xf32>
    %106 = vector.broadcast %105 : vector<1x32xf32> to vector<8x32xf32>
    %107 = arith.addf %104, %106 : vector<8x32xf32>
    %cst_59 = arith.constant 0.000000e+00 : f32
    %108 = vector.broadcast %cst_59 : f32 to vector<8x32xf32>
    %109 = arith.maximumf %107, %108 : vector<8x32xf32>
    %c0_60 = arith.constant 0 : index
    %c0_61 = arith.constant 0 : index
    %110 = vector.load %arg16[%c0_60, %c0_61] : memref<1x32xf32, #tpu.memory_space<vmem>>, vector<1x32xf32>
    %c0_62 = arith.constant 0 : index
    %c0_63 = arith.constant 0 : index
    %111 = vector.load %arg17[%c0_62, %c0_63] : memref<1x32xf32, #tpu.memory_space<vmem>>, vector<1x32xf32>
    %cst_64 = arith.constant dense<0.000000e+00> : vector<8xf32>
    %112 = vector.multi_reduction <add>, %109, %cst_64 [1] : vector<8x32xf32> to vector<8xf32>
    %113 = vector.shape_cast %112 : vector<8xf32> to vector<8x1xf32>
    %cst_65 = arith.constant 3.200000e+01 : f32
    %114 = vector.broadcast %cst_65 : f32 to vector<8x1xf32>
    %115 = arith.divf %113, %114 : vector<8x1xf32>
    %116 = vector.broadcast %115 : vector<8x1xf32> to vector<8x32xf32>
    %117 = arith.subf %109, %116 : vector<8x32xf32>
    %118 = arith.mulf %117, %117 : vector<8x32xf32>
    %cst_66 = arith.constant dense<0.000000e+00> : vector<8xf32>
    %119 = vector.multi_reduction <add>, %118, %cst_66 [1] : vector<8x32xf32> to vector<8xf32>
    %120 = vector.shape_cast %119 : vector<8xf32> to vector<8x1xf32>
    %cst_67 = arith.constant 3.200000e+01 : f32
    %121 = vector.broadcast %cst_67 : f32 to vector<8x1xf32>
    %122 = arith.divf %120, %121 : vector<8x1xf32>
    %123 = vector.broadcast %115 : vector<8x1xf32> to vector<8x32xf32>
    %124 = arith.subf %109, %123 : vector<8x32xf32>
    %cst_68 = arith.constant 9.99999974E-6 : f32
    %125 = vector.broadcast %cst_68 : f32 to vector<8x1xf32>
    %126 = arith.addf %122, %125 : vector<8x1xf32>
    %127 = math.rsqrt %126 : vector<8x1xf32>
    %128 = vector.broadcast %127 : vector<8x1xf32> to vector<8x32xf32>
    %129 = arith.mulf %124, %128 : vector<8x32xf32>
    %130 = vector.broadcast %110 : vector<1x32xf32> to vector<8x32xf32>
    %131 = arith.mulf %129, %130 : vector<8x32xf32>
    %132 = vector.broadcast %111 : vector<1x32xf32> to vector<8x32xf32>
    %133 = arith.addf %131, %132 : vector<8x32xf32>
    %c0_69 = arith.constant 0 : index
    %c0_70 = arith.constant 0 : index
    %134 = vector.load %arg18[%c0_69, %c0_70] : memref<16x32xf32, #tpu.memory_space<vmem>>, vector<8x32xf32>
    tpu.vector_store %arg18[%c0_69, %c0_70], %133 {strides = array<i32>} : memref<16x32xf32, #tpu.memory_space<vmem>>, vector<8x32xf32>,
    %135 = vector.extract_strided_slice %48 {offsets = [8, 0], sizes = [8, 128], strides = [1, 1]} : vector<16x128xf32> to vector<8x128xf32>
    %136 = vector.extract_strided_slice %52 {offsets = [8, 0], sizes = [8, 128], strides = [1, 1]} : vector<16x128xf32> to vector<8x128xf32>
    %137 = vector.extract_strided_slice %53 {offsets = [8, 0], sizes = [8, 128], strides = [1, 1]} : vector<16x128xf32> to vector<8x128xf32>
    %138 = vector.extract_strided_slice %1 {offsets = [8, 0], sizes = [8, 32], strides = [1, 1]} : vector<16x32xf32> to vector<8x32xf32>
    %cst_71 = arith.constant dense<0.000000e+00> : vector<128x128xf32>
    %139 = tpu.matmul %135, %136, %cst_71 {dimension_numbers = #tpu.dot_dimension_numbers<[0], [0], [1], [1], [0, 1, 1, 1], [], []>} : vector<8x128xf32>, vector<8x128xf32>, vector<128x128xf32> -> vector<128x128xf32>
    %140 = vector.broadcast %55 : f32 to vector<128x128xf32>
    %141 = arith.mulf %139, %140 : vector<128x128xf32>
    %cst_72 = arith.constant dense<0xFF800000> : vector<128xf32>
    %142 = vector.multi_reduction <maximumf>, %141, %cst_72 [1] : vector<128x128xf32> to vector<128xf32>
    %143 = vector.shape_cast %142 : vector<128xf32> to vector<128x1xf32>
    %144 = vector.broadcast %143 : vector<128x1xf32> to vector<128x128xf32>
    %145 = arith.subf %141, %144 : vector<128x128xf32>
    %146 = math.exp %145 : vector<128x128xf32>
    %cst_73 = arith.constant dense<0.000000e+00> : vector<128xf32>
    %147 = vector.multi_reduction <add>, %146, %cst_73 [1] : vector<128x128xf32> to vector<128xf32>
    %148 = vector.shape_cast %147 : vector<128xf32> to vector<128x1xf32>
    %149 = tpu.reciprocal %148 {approx = true} : vector<128x1xf32> -> vector<128x1xf32>
    %150 = vector.broadcast %149 : vector<128x1xf32> to vector<128x128xf32>
    %151 = arith.mulf %146, %150 : vector<128x128xf32>
    %cst_74 = arith.constant dense<0.000000e+00> : vector<8x128xf32>
    %152 = tpu.matmul %137, %151, %cst_74 {dimension_numbers = #tpu.dot_dimension_numbers<[1], [1], [0], [0], [0, 0, 1, 0], [], []>} : vector<8x128xf32>, vector<128x128xf32>, vector<8x128xf32> -> vector<8x128xf32>
    %cst_75 = arith.constant dense<0.000000e+00> : vector<8x32xf32>
    %153 = tpu.matmul %152, %56, %cst_75 {dimension_numbers = #tpu.dot_dimension_numbers<[1], [0], [0], [1], [0, 0, 1, 1], [], []>} : vector<8x128xf32>, vector<128x32xf32>, vector<8x32xf32> -> vector<8x32xf32>
    %154 = arith.addf %138, %153 : vector<8x32xf32>
    %c0_76 = arith.constant 0 : index
    %c0_77 = arith.constant 0 : index
    %155 = vector.load %arg12[%c0_76, %c0_77] : memref<1x32xf32, #tpu.memory_space<vmem>>, vector<1x32xf32>
    %c0_78 = arith.constant 0 : index
    %c0_79 = arith.constant 0 : index
    %156 = vector.load %arg13[%c0_78, %c0_79] : memref<1x32xf32, #tpu.memory_space<vmem>>, vector<1x32xf32>
    %cst_80 = arith.constant dense<0.000000e+00> : vector<8xf32>
    %157 = vector.multi_reduction <add>, %154, %cst_80 [1] : vector<8x32xf32> to vector<8xf32>
    %158 = vector.shape_cast %157 : vector<8xf32> to vector<8x1xf32>
    %cst_81 = arith.constant 3.200000e+01 : f32
    %159 = vector.broadcast %cst_81 : f32 to vector<8x1xf32>
    %160 = arith.divf %158, %159 : vector<8x1xf32>
    %161 = vector.broadcast %160 : vector<8x1xf32> to vector<8x32xf32>
    %162 = arith.subf %154, %161 : vector<8x32xf32>
    %163 = arith.mulf %162, %162 : vector<8x32xf32>
    %cst_82 = arith.constant dense<0.000000e+00> : vector<8xf32>
    %164 = vector.multi_reduction <add>, %163, %cst_82 [1] : vector<8x32xf32> to vector<8xf32>
    %165 = vector.shape_cast %164 : vector<8xf32> to vector<8x1xf32>
    %cst_83 = arith.constant 3.200000e+01 : f32
    %166 = vector.broadcast %cst_83 : f32 to vector<8x1xf32>
    %167 = arith.divf %165, %166 : vector<8x1xf32>
    %168 = vector.broadcast %160 : vector<8x1xf32> to vector<8x32xf32>
    %169 = arith.subf %154, %168 : vector<8x32xf32>
    %cst_84 = arith.constant 9.99999974E-6 : f32
    %170 = vector.broadcast %cst_84 : f32 to vector<8x1xf32>
    %171 = arith.addf %167, %170 : vector<8x1xf32>
    %172 = math.rsqrt %171 : vector<8x1xf32>
    %173 = vector.broadcast %172 : vector<8x1xf32> to vector<8x32xf32>
    %174 = arith.mulf %169, %173 : vector<8x32xf32>
    %175 = vector.broadcast %155 : vector<1x32xf32> to vector<8x32xf32>
    %176 = arith.mulf %174, %175 : vector<8x32xf32>
    %177 = vector.broadcast %156 : vector<1x32xf32> to vector<8x32xf32>
    %178 = arith.addf %176, %177 : vector<8x32xf32>
    %179 = vector.extract_strided_slice %49 {offsets = [8, 0], sizes = [8, 32], strides = [1, 1]} : vector<16x32xf32> to vector<8x32xf32>
    %cst_85 = arith.constant dense<0.000000e+00> : vector<8x32xf32>
    %180 = tpu.matmul %178, %57, %cst_85 {dimension_numbers = #tpu.dot_dimension_numbers<[1], [0], [0], [1], [0, 0, 1, 1], [], []>} : vector<8x32xf32>, vector<32x32xf32>, vector<8x32xf32> -> vector<8x32xf32>
    %181 = arith.addf %179, %180 : vector<8x32xf32>
    %c0_86 = arith.constant 0 : index
    %c0_87 = arith.constant 0 : index
    %182 = vector.load %arg15[%c0_86, %c0_87] : memref<1x32xf32, #tpu.memory_space<vmem>>, vector<1x32xf32>
    %183 = vector.broadcast %182 : vector<1x32xf32> to vector<8x32xf32>
    %184 = arith.addf %181, %183 : vector<8x32xf32>
    %cst_88 = arith.constant 0.000000e+00 : f32
    %185 = vector.broadcast %cst_88 : f32 to vector<8x32xf32>
    %186 = arith.maximumf %184, %185 : vector<8x32xf32>
    %c0_89 = arith.constant 0 : index
    %c0_90 = arith.constant 0 : index
    %187 = vector.load %arg16[%c0_89, %c0_90] : memref<1x32xf32, #tpu.memory_space<vmem>>, vector<1x32xf32>
    %c0_91 = arith.constant 0 : index
    %c0_92 = arith.constant 0 : index
    %188 = vector.load %arg17[%c0_91, %c0_92] : memref<1x32xf32, #tpu.memory_space<vmem>>, vector<1x32xf32>
    %cst_93 = arith.constant dense<0.000000e+00> : vector<8xf32>
    %189 = vector.multi_reduction <add>, %186, %cst_93 [1] : vector<8x32xf32> to vector<8xf32>
    %190 = vector.shape_cast %189 : vector<8xf32> to vector<8x1xf32>
    %cst_94 = arith.constant 3.200000e+01 : f32
    %191 = vector.broadcast %cst_94 : f32 to vector<8x1xf32>
    %192 = arith.divf %190, %191 : vector<8x1xf32>
    %193 = vector.broadcast %192 : vector<8x1xf32> to vector<8x32xf32>
    %194 = arith.subf %186, %193 : vector<8x32xf32>
    %195 = arith.mulf %194, %194 : vector<8x32xf32>
    %cst_95 = arith.constant dense<0.000000e+00> : vector<8xf32>
    %196 = vector.multi_reduction <add>, %195, %cst_95 [1] : vector<8x32xf32> to vector<8xf32>
    %197 = vector.shape_cast %196 : vector<8xf32> to vector<8x1xf32>
    %cst_96 = arith.constant 3.200000e+01 : f32
    %198 = vector.broadcast %cst_96 : f32 to vector<8x1xf32>
    %199 = arith.divf %197, %198 : vector<8x1xf32>
    %200 = vector.broadcast %192 : vector<8x1xf32> to vector<8x32xf32>
    %201 = arith.subf %186, %200 : vector<8x32xf32>
    %cst_97 = arith.constant 9.99999974E-6 : f32
    %202 = vector.broadcast %cst_97 : f32 to vector<8x1xf32>
    %203 = arith.addf %199, %202 : vector<8x1xf32>
    %204 = math.rsqrt %203 : vector<8x1xf32>
    %205 = vector.broadcast %204 : vector<8x1xf32> to vector<8x32xf32>
    %206 = arith.mulf %201, %205 : vector<8x32xf32>
    %207 = vector.broadcast %187 : vector<1x32xf32> to vector<8x32xf32>
    %208 = arith.mulf %206, %207 : vector<8x32xf32>
    %209 = vector.broadcast %188 : vector<1x32xf32> to vector<8x32xf32>
    %210 = arith.addf %208, %209 : vector<8x32xf32>
    %c8 = arith.constant 8 : index
    %c0_98 = arith.constant 0 : index
    %211 = vector.load %arg18[%c8, %c0_98] : memref<16x32xf32, #tpu.memory_space<vmem>>, vector<8x32xf32>
    tpu.vector_store %arg18[%c8, %c0_98], %210 {strides = array<i32>} : memref<16x32xf32, #tpu.memory_space<vmem>>, vector<8x32xf32>,
    return
  }
  func.func @transform_0(%arg0: i32) -> (i32, i32) {
    %c0_i32 = arith.constant 0 : i32
    %c0_i32_0 = arith.constant 0 : i32
    return %arg0, %c0_i32 : i32, i32
  }
  func.func @transform_1(%arg0: i32) -> (i32, i32) {
    %c0_i32 = arith.constant 0 : i32
    %c0_i32_0 = arith.constant 0 : i32
    return %arg0, %c0_i32 : i32, i32
  }
  func.func @transform_2(%arg0: i32) -> (i32, i32) {
    %c0_i32 = arith.constant 0 : i32
    %c0_i32_0 = arith.constant 0 : i32
    %c0_i32_1 = arith.constant 0 : i32
    return %c0_i32, %c0_i32_0 : i32, i32
  }
  func.func @transform_3(%arg0: i32) -> (i32, i32) {
    %c0_i32 = arith.constant 0 : i32
    %c0_i32_0 = arith.constant 0 : i32
    %c0_i32_1 = arith.constant 0 : i32
    return %c0_i32, %c0_i32_0 : i32, i32
  }
  func.func @transform_4(%arg0: i32) -> (i32, i32, i32) {
    %c0_i32 = arith.constant 0 : i32
    %c0_i32_0 = arith.constant 0 : i32
    %c0_i32_1 = arith.constant 0 : i32
    %c0_i32_2 = arith.constant 0 : i32
    return %c0_i32, %c0_i32_0, %c0_i32_1 : i32, i32, i32
  }
  func.func @transform_5(%arg0: i32) -> (i32, i32) {
    %c0_i32 = arith.constant 0 : i32
    %c0_i32_0 = arith.constant 0 : i32
    %c0_i32_1 = arith.constant 0 : i32
    return %c0_i32, %c0_i32_0 : i32, i32
  }
  func.func @transform_6(%arg0: i32) -> (i32, i32) {
    %c0_i32 = arith.constant 0 : i32
    %c0_i32_0 = arith.constant 0 : i32
    %c0_i32_1 = arith.constant 0 : i32
    return %c0_i32, %c0_i32_0 : i32, i32
  }
  func.func @transform_7(%arg0: i32) -> (i32, i32) {
    %c0_i32 = arith.constant 0 : i32
    %c0_i32_0 = arith.constant 0 : i32
    %c0_i32_1 = arith.constant 0 : i32
    return %c0_i32, %c0_i32_0 : i32, i32
  }
  func.func @transform_8(%arg0: i32) -> (i32, i32) {
    %c0_i32 = arith.constant 0 : i32
    %c0_i32_0 = arith.constant 0 : i32
    %c0_i32_1 = arith.constant 0 : i32
    return %c0_i32, %c0_i32_0 : i32, i32
  }
  func.func @transform_9(%arg0: i32) -> (i32, i32) {
    %c0_i32 = arith.constant 0 : i32
    %c0_i32_0 = arith.constant 0 : i32
    %c0_i32_1 = arith.constant 0 : i32
    return %c0_i32, %c0_i32_0 : i32, i32
  }
  func.func @transform_10(%arg0: i32) -> (i32, i32) {
    %c0_i32 = arith.constant 0 : i32
    %c0_i32_0 = arith.constant 0 : i32
    %c0_i32_1 = arith.constant 0 : i32
    return %c0_i32, %c0_i32_0 : i32, i32
  }
  func.func @transform_11(%arg0: i32) -> (i32, i32) {
    %c0_i32 = arith.constant 0 : i32
    %c0_i32_0 = arith.constant 0 : i32
    %c0_i32_1 = arith.constant 0 : i32
    return %c0_i32, %c0_i32_0 : i32, i32
  }
  func.func @transform_12(%arg0: i32) -> (i32, i32) {
    %c0_i32 = arith.constant 0 : i32
    %c0_i32_0 = arith.constant 0 : i32
    %c0_i32_1 = arith.constant 0 : i32
    return %c0_i32, %c0_i32_0 : i32, i32
  }
  func.func @transform_13(%arg0: i32) -> (i32, i32) {
    %c0_i32 = arith.constant 0 : i32
    %c0_i32_0 = arith.constant 0 : i32
    %c0_i32_1 = arith.constant 0 : i32
    return %c0_i32, %c0_i32_0 : i32, i32
  }
  func.func @transform_14(%arg0: i32) -> (i32, i32) {
    %c0_i32 = arith.constant 0 : i32
    %c0_i32_0 = arith.constant 0 : i32
    %c0_i32_1 = arith.constant 0 : i32
    return %c0_i32, %c0_i32_0 : i32, i32
  }
  func.func @transform_15(%arg0: i32) -> (i32, i32) {
    %c0_i32 = arith.constant 0 : i32
    %c0_i32_0 = arith.constant 0 : i32
    %c0_i32_1 = arith.constant 0 : i32
    return %c0_i32, %c0_i32_0 : i32, i32
  }
  func.func @transform_16(%arg0: i32) -> (i32, i32) {
    %c0_i32 = arith.constant 0 : i32
    %c0_i32_0 = arith.constant 0 : i32
    %c0_i32_1 = arith.constant 0 : i32
    return %c0_i32, %c0_i32_0 : i32, i32
  }
  func.func @transform_17(%arg0: i32) -> (i32, i32) {
    %c0_i32 = arith.constant 0 : i32
    %c0_i32_0 = arith.constant 0 : i32
    return %arg0, %c0_i32 : i32, i32
  }
}

</mosaic_0001>

<bundles_post_ra>
// kernel: tpu_custom_call.1
= control target key start
LH: loop header
LB: loop body
LE: loop exit
PB: predicated region body
PF: predicated region fallthrough
CT: control target
= control target key end

     0   :  { %s4975_s0 = inlined_call_operand.hbm [shape: f32[32,32], index: 0, kind: input, shape index: {}]   ;;  %s4976_s1 = inlined_call_operand.hbm [shape: f32[32,32], index: 1, kind: input, shape index: {}]   ;;  %s4977_s2 = inlined_call_operand.hbm [shape: f32[16,16], index: 2, kind: input, shape index: {}]   ;;  %s4978_s3 = inlined_call_operand.hbm [shape: f32[16,16], index: 3, kind: input, shape index: {}]   ;;  %s4979_s4 = inlined_call_operand.vmem [shape: f32[3,32,32], index: 4, kind: input, shape index: {}]   ;;  %s4980_s5 = inlined_call_operand.vmem [shape: f32[1,32], index: 5, kind: input, shape index: {}]   ;;  %s4981_s6 = inlined_call_operand.vmem [shape: f32[1,32], index: 6, kind: input, shape index: {}]   ;;  %s4982_s7 = inlined_call_operand.vmem [shape: f32[1,32], index: 7, kind: input, shape index: {}]   ;;  %s4983_s8 = inlined_call_operand.vmem [shape: f32[32,160], index: 8, kind: input, shape index: {}]   ;;  %s4984_s9 = inlined_call_operand.hbm [shape: f32[32,256], index: 9, kind: input, shape index: {}]   ;;  %s4985_s10 = inlined_call_operand.vmem [shape: f32[128,32], index: 10, kind: input, shape index: {}]   ;;  %s4986_s11 = inlined_call_operand.vmem [shape: f32[1,32], index: 11, kind: input, shape index: {}]   ;;  %s4987_s12 = inlined_call_operand.vmem [shape: f32[1,32], index: 12, kind: input, shape index: {}]   ;;  %s4988_s13 = inlined_call_operand.hbm [shape: f32[32,32], index: 13, kind: input, shape index: {}]   ;;  %s4989_s14 = inlined_call_operand.vmem [shape: f32[1,32], index: 14, kind: input, shape index: {}]   ;;  %s4990_s15 = inlined_call_operand.vmem [shape: f32[1,32], index: 15, kind: input, shape index: {}]   ;;  %s4991_s16 = inlined_call_operand.vmem [shape: f32[1,32], index: 16, kind: input, shape index: {}]   ;;  %s4992_s17 = inlined_call_operand.hbm [shape: f32[32,32], index: 17, kind: output, shape index: {}]  }
   0x1   :  { %5007 = sst [smem:[#allocation24_spill]] %s4975_s0 }
   0x2   :  { %5008 = sst [smem:[#allocation25_spill]] %s4976_s1 }
   0x3   :  { %5009 = sst [smem:[#allocation26_spill]] %s4977_s2 }
   0x4   :  { %5010 = sst [smem:[#allocation27_spill]] %s4978_s3 }
   0x5   :  { %5011 = sst [smem:[#allocation28_spill]] %s4984_s9 }
   0x6   :  { %5012 = sst [smem:[#allocation29_spill]] %s4985_s10 }
   0x7   :  { %5013 = sst [smem:[#allocation30_spill]] %s4986_s11 }
   0x8   :  { %5014 = sst [smem:[#allocation31_spill]] %s4987_s12 }
   0x9   :  { %5015 = sst [smem:[#allocation32_spill]] %s4988_s13 }
   0xa   :  { %5016 = sst [smem:[#allocation33_spill]] %s4989_s14 }
   0xb   :  { %5017 = sst [smem:[#allocation34_spill]] %s4990_s15 }
   0xc   :  { %5018 = sst [smem:[#allocation35_spill]] %s4991_s16 }
   0xd   :  { %5019 = sst [smem:[#allocation36_spill]] %s4992_s17 }
   0xe   :  { %22 = vsyncpa [#allocation3], 0 }
   0xf   :  { %24 = vsyncpa [#allocation3 + $0x1], 0 }
  0x10   :  { %25 = vsyncpa [#allocation6], 0 }
  0x11   :  { %27 = vsyncpa [#allocation6 + $0x1], 0 }
  0x12   :  { %28 = vsyncpa [#allocation9], 0 }
  0x13   :  { %29 = vsyncpa [#allocation12], 0 }
  0x14   :  { %30 = vsyncpa [#allocation4], 0 }
  0x15   :  { %32 = vsyncpa [#allocation4 + $0x1], 0  ;;  %s4103_s24 = smov 0   ;;  %s4105_s25 = smov 0  }
  0x16   :  { %s4107_s26 = smov 0   ;;  %s4109_s27 = smov 0  }
  0x17 LB: > { %5020 = sst [smem:[#allocation20_spill]] %s3983_s24  ;;  %s4124_s28 = sadd.s32 4294967295, %s3995_s27   ;;  %s3995_s27 = sphi %s4109_s27, %s5063_s27   ;;  %s3991_s26 = sphi %s4107_s26, %s5060_s26   ;;  %s3987_s25 = sphi %s4105_s25, %s5062_s25   ;;  %s3983_s24 = sphi %s4103_s24, %s5061_s24  }
  0x18   : > { %5021 = sst [smem:[#allocation21_spill]] %s3991_s26  ;;  %s2842_s29 = sadd.s32 4294967294, %s3995_s27  }
  0x19   : > { %p58_p0 = scmp.ne.s32.totalorder %s3987_s25, %s3983_s24  ;;  %p4998_p1 = scmp.eq.s32.totalorder %s4124_s28, 0 }
  0x1a   : > { %p429_p3 = scmp.eq.s32.totalorder %s2842_s29, 1  ;;  %p2843_p5 = scmp.ge.s32.totalorder %s3995_s27, 1 }
  0x1b   : > { %p4133_p4 = por %p4998_p1, %p58_p0  ;;  %p436_p7 = scmp.lt.s32.totalorder %s3995_s27, 3 }
  0x1c   : > { %p4138_p6 = por %p429_p3, %p58_p0  ;;  %s3997_s19 = smov [#allocation7]  }
  0x1d   : > { %s5022_s0 = scalar_select %p4133_p4, 1, 0 }
  0x1e   : > { %s5023_s30 = scalar_select %p4138_p6, 1, 0 }
  0x1f   : > { %p4143_p8 = pnand %p2843_p5, %p436_p7  ;;  %s448_s1 = sshll.u32 %s3997_s19, 4  ;;  %s4147_s1 = int_to_ptr.vmem [resolvable:$true] %s448_s1 }
  0x20   : > { %5024 = sst [smem:[#allocation22_spill]] %s5023_s30  ;;  %s3998_s21 = smov [#allocation8]  }
  0x21   : > { %s5025_s18 = scalar_select %p4143_p8, 1, 0 }
  0x22   : > { %p3521_p9 = pneg %p4143_p8  ;;  %s461_s22 = sshll.u32 %s3998_s21, 4  ;;  %s4158_s22 = int_to_ptr.vmem [resolvable:$true] %s461_s22 }
  0x23   : > { %s3999_s23 = smov [#allocation10]   ;;  %s5027_s2 = sld [smem:[#allocation26_spill]] }
  0x24   : > { %p4154_p11 = pnand %p3521_p9, %p4998_p1  ;;  %s4160_s29 = sshll.u32 %s3999_s23, 4  ;;  %s490_s29 = int_to_ptr.vmem [resolvable:$true] %s4160_s29 }
  0x26   : > { %p4170_p13 = pneg %p4154_p11 }
  0x29   : > { %s3741_s24 = scalar_lea.hbm %s5027_s2, 256 }
  0x2a   : > { %p3742_p12 = scmp.ne.s32.totalorder %s5027_s2, %s3741_s24  ;;  %p3748_p5 = scmp.lt.u32.totalorder %s3741_s24, %s5027_s2 }
  0x2c   : > { %p3744_p0 = pnand %p4170_p13, %p3742_p12 }
  0x2e   : > { %p3745_p3 = pneg %p3744_p0 }
  0x30   : > { %p3750_p7 = pnand %p3748_p5, %p3745_p3 }
  0x32   : > { %3753 = shalt.err (!%p3750_p7)
}
  0x33   : > { %s3754_s16 = scalar_lea.vmem %s4147_s1, 256  ;;  %p3762_p2 = scmp.lt.s32.totalorder %s4147_s1, %s4147_s1 }
  0x34   : > { %p3755_p9 = scmp.ne.s32.totalorder %s4147_s1, %s3754_s16  ;;  %p3763_p6 = scmp.lt.s32.totalorder %s3754_s16, %s3754_s16 }
  0x36   : > { %p3757_p10 = pnand %p3755_p9, %p4170_p13  ;;  %p3764_p12 = por %p3763_p6, %p3762_p2 }
  0x38   : > { %p3758_p1 = pneg %p3757_p10 }
  0x3a   : > { %p3765_p0 = pnand %p3764_p12, %p3758_p1 }
  0x3c   : > { %3768 = shalt.err (!%p3765_p0)
}
  0x3d   : > { %s5002_s17 = smov 128   ;;  %s5004_s24 = smov 8  }
  0x3e   : > { %3524 = dma.hbm_to_vmem [thread:$0]  (!%p4154_p11), %s5027_s2, 256, %s4147_s1, [#allocation6], %s5002_s17, %s5002_s17, %s5004_s24  }
  0x3f   : > { %s5029_s3 = sld [smem:[#allocation27_spill]] }
  0x45   : > { %s3769_s16 = scalar_lea.hbm %s5029_s3, 256 }
  0x46   : > { %p3770_p1 = scmp.ne.s32.totalorder %s5029_s3, %s3769_s16  ;;  %p3776_p10 = scmp.lt.u32.totalorder %s3769_s16, %s5029_s3 }
  0x48   : > { %p3772_p2 = pnand %p3770_p1, %p4170_p13 }
  0x4a   : > { %p3773_p6 = pneg %p3772_p2 }
  0x4c   : > { %p3778_p3 = pnand %p3776_p10, %p3773_p6 }
  0x4e   : > { %3781 = shalt.err (!%p3778_p3)
}
  0x4f   : > { %s3782_s1 = scalar_lea.vmem %s4158_s22, 256  ;;  %p3790_p12 = scmp.lt.s32.totalorder %s4158_s22, %s4158_s22 }
  0x50   : > { %p3783_p5 = scmp.ne.s32.totalorder %s4158_s22, %s3782_s1  ;;  %p3791_p0 = scmp.lt.s32.totalorder %s3782_s1, %s3782_s1 }
  0x52   : > { %p3785_p7 = pnand %p3783_p5, %p4170_p13  ;;  %p3792_p1 = por %p3791_p0, %p3790_p12 }
  0x54   : > { %p3786_p9 = pneg %p3785_p7 }
  0x56   : > { %p3793_p2 = pnand %p3792_p1, %p3786_p9 }
  0x58   : > { %3796 = shalt.err (!%p3793_p2)
}
  0x59   : > { %3527 = dma.hbm_to_vmem [thread:$0]  (!%p4154_p11), %s5029_s3, 256, %s4158_s22, [#allocation9], %s5002_s17, %s5002_s17, %s5004_s24  }
  0x5a   : > { %s5030_s9 = sld [smem:[#allocation28_spill]] }
  0x60   : > { %s3797_s30 = scalar_lea.hbm %s5030_s9, 1024 }
  0x61   : > { %p3798_p6 = scmp.ne.s32.totalorder %s5030_s9, %s3797_s30  ;;  %p3804_p5 = scmp.lt.u32.totalorder %s3797_s30, %s5030_s9 }
  0x63   : > { %p3800_p10 = pnand %p3798_p6, %p4170_p13 }
  0x65   : > { %p3801_p3 = pneg %p3800_p10 }
  0x67   : > { %p3806_p7 = pnand %p3804_p5, %p3801_p3 }
  0x69   : > { %3809 = shalt.err (!%p3806_p7)
}
  0x6a   : > { %s3810_s1 = scalar_lea.vmem %s490_s29, 1024  ;;  %p3818_p1 = scmp.lt.s32.totalorder %s490_s29, %s490_s29 }
  0x6b   : > { %p3811_p9 = scmp.ne.s32.totalorder %s490_s29, %s3810_s1  ;;  %p3819_p2 = scmp.lt.s32.totalorder %s3810_s1, %s3810_s1 }
  0x6d   : > { %p3813_p12 = pnand %p3811_p9, %p4170_p13  ;;  %p3820_p4 = por %p3819_p2, %p3818_p1 }
  0x6f   : > { %p3814_p0 = pneg %p3813_p12 }
  0x71   : > { %p3821_p8 = pnand %p3820_p4, %p3814_p0 }
  0x73   : > { %3824 = shalt.err (!%p3821_p8)
}
  0x74   : > { %s4002_s22 = smov 256   ;;  %s4003_s10 = smov 16  }
  0x75   : > { %3530 = dma.hbm_to_vmem [thread:$0]  (!%p4154_p11), %s5030_s9, 1024, %s490_s29, [#allocation9], %s4002_s22, %s4002_s22, %s4003_s10  }
  0x76   : > { %s4004_s14 = smov [#allocation11]   ;;  %s5031_s13 = sld [smem:[#allocation32_spill]] }
  0x77   : > { %s511_s30 = sshll.u32 %s4004_s14, 4  ;;  %s512_s30 = int_to_ptr.vmem [resolvable:$true] %s511_s30 }
  0x7c   : > { %s3825_s23 = scalar_lea.hbm %s5031_s13, 512 }
  0x7d   : > { %p3826_p4 = scmp.ne.s32.totalorder %s5031_s13, %s3825_s23  ;;  %p3832_p10 = scmp.lt.u32.totalorder %s3825_s23, %s5031_s13 }
  0x7f   : > { %p3828_p8 = pnand %p3826_p4, %p4170_p13 }
  0x81   : > { %p3829_p6 = pneg %p3828_p8 }
  0x83   : > { %p3834_p3 = pnand %p3832_p10, %p3829_p6 }
  0x85   : > { %3837 = shalt.err (!%p3834_p3)
}
  0x86   : > { %s3838_s29 = scalar_lea.vmem %s512_s30, 512  ;;  %p3846_p12 = scmp.lt.s32.totalorder %s512_s30, %s512_s30 }
  0x87   : > { %p3839_p5 = scmp.ne.s32.totalorder %s512_s30, %s3838_s29  ;;  %p3847_p0 = scmp.lt.s32.totalorder %s3838_s29, %s3838_s29 }
  0x89   : > { %p3841_p7 = pnand %p3839_p5, %p4170_p13  ;;  %p3848_p1 = por %p3847_p0, %p3846_p12 }
  0x8b   : > { %p3842_p9 = pneg %p3841_p7 }
  0x8d   : > { %p3849_p2 = pnand %p3848_p1, %p3842_p9 }
  0x8f   : > { %3852 = shalt.err (!%p3849_p2)
}
  0x90   : > { %s5032_s22 = smov 8   ;;  %s5033_s10 = smov 128  }
  0x91   : > { %3533 = dma.hbm_to_vmem [thread:$0]  (!%p4154_p11), %s5031_s13, 512, %s512_s30, [#allocation12], %s5033_s10, %s5033_s10, %s5032_s22  }
  0x92   : > { %s4261_s15 = sadd.s32 1, %s3995_s27   ;;  %s45_s20 = sadd.s32 1, %s3991_s26 }
  0x93   : > { %s42_s11 = ssub.s32 %s3995_s27, %s4261_s15  ;;  %p52_p13 = scmp.ne.s32.totalorder %s3991_s26, %s3987_s25 }
  0x94   : > { %p43_p4 = scmp.eq.s32.totalorder %s42_s11, 0  ;;  %p53_p8 = scmp.eq.s32.totalorder %s3995_s27, 0 }
  0x95   : > { %p5034_p6 = scmp.eq.s32.totalorder %s4124_s28, 1  ;;  %p3549_p3 = scmp.lt.s32.totalorder %s3995_s27, 2 }
  0x96   : > { %s4277_s14 = scalar_select %p43_p4, %s3991_s26, %s45_s20  }
  0x97   : > { %p4271_p10 = por %p5034_p6, %p52_p13  ;;  %p54_p5 = por %p53_p8, %p52_p13 }
  0x98   : > { %5036 = sst [smem:[#allocation23_spill]] %s4277_s14  ;;  %s534_s19 = sand.u32 1, %s3991_s26  }
  0x99   : > { %s2849_s21 = sshll.u32 %s534_s19, 4  ;;  %s2937_s30 = sshll.u32 %s3995_s27, 8 }
  0x9a   : > { %s5037_s1 = sld [smem:[#allocation24_spill]]  ;;  %s538_s17 = scalar_lea.vmem [#allocation2], %s2849_s21 }
  0x9b   : > { %s545_s24 = sshll.u32 %s538_s17, 4  ;;  %p4288_p11 = pnand %p3549_p3, %p54_p5  ;;  %s4286_s24 = int_to_ptr.vmem [resolvable:$true] %s545_s24 }
  0x9c   : > { %s5039_s3 = sld [smem:[#allocation25_spill]]  ;;  %s559_s16 = scalar_lea.vmem [#allocation5], %s2849_s21 }
  0x9d   : > { %s4297_s9 = sshll.u32 %s559_s16, 4  ;;  %s4299_s13 = scalar_lea.sflag [#allocation3], %s534_s19  ;;  %s4331_s9 = int_to_ptr.vmem [resolvable:$true] %s4297_s9 }
  0x9e   : > { %p3855_p9 = pneg %p4288_p11 }
  0xa0   : > { %s4284_s29 = scalar_lea.hbm %s5037_s1, %s2937_s30  ;;  %s3858_s2 = scalar_lea.hbm %s5037_s1, 512 }
  0xa1   : > { %s3853_s17 = scalar_lea.hbm %s4284_s29, 256  ;;  %p3859_p1 = scmp.lt.u32.totalorder %s4284_s29, %s5037_s1 }
  0xa2   : > { %s4295_s23 = scalar_lea.hbm %s5039_s3, %s2937_s30  ;;  %p3854_p7 = scmp.ne.s32.totalorder %s4284_s29, %s3853_s17 }
  0xa3   : > { %p3860_p2 = scmp.lt.u32.totalorder %s3858_s2, %s3853_s17  ;;  %p3862_p4 = scmp.lt.u32.totalorder %s3853_s17, %s4284_s29 }
  0xa4   : > { %p3856_p12 = pnand %p3855_p9, %p3854_p7 }
  0xa5   : > { %p3861_p13 = por %p3860_p2, %p3859_p1 }
  0xa6   : > { %p3857_p0 = pneg %p3856_p12 }
  0xa7   : > { %p3863_p8 = por %p3862_p4, %p3861_p13 }
  0xa9   : > { %p3864_p6 = pnand %p3863_p8, %p3857_p0 }
  0xab   : > { %3867 = shalt.err (!%p3864_p6)
}
  0xac   : > { %s3868_s19 = scalar_lea.vmem %s4286_s24, 256  ;;  %s4005_s26 = smov [#allocation2]  }
  0xad   : > { %p3869_p3 = scmp.ne.s32.totalorder %s4286_s24, %s3868_s19  ;;  %s3873_s14 = sshll.u32 %s4005_s26, 4  ;;  %s3874_s14 = int_to_ptr.vmem [resolvable:$false] %s3873_s14 }
  0xae   : > { %s3875_s21 = scalar_lea.vmem %s3874_s14, 512  ;;  %p3876_p12 = scmp.lt.s32.totalorder %s4286_s24, %s3874_s14 }
  0xaf   : > { %p3871_p5 = pnand %p3869_p3, %p3855_p9  ;;  %p3877_p1 = scmp.lt.s32.totalorder %s3875_s21, %s3868_s19 }
  0xb1   : > { %p3872_p7 = pneg %p3871_p5  ;;  %p3878_p2 = por %p3877_p1, %p3876_p12 }
  0xb3   : > { %p3879_p13 = pnand %p3878_p2, %p3872_p7 }
  0xb5   : > { %3882 = shalt.err (!%p3879_p13)
}
  0xb6   : > { %3537 = dma.hbm_to_vmem [thread:$0]  (!%p4288_p11), %s4284_s29, 256, %s4286_s24, %s4299_s13, %s5033_s10, %s5033_s10, %s5032_s22  }
  0xb7   : > { %s555_s16 = sand.u32 1, %s3995_s27   ;;  %s3883_s2 = scalar_lea.hbm %s4295_s23, 256 }
  0xb8   : > { %s4334_s17 = scalar_lea.sflag [#allocation6], %s555_s16  ;;  %p3884_p0 = scmp.ne.s32.totalorder %s4295_s23, %s3883_s2 }
  0xb9   : > { %s3888_s19 = scalar_lea.hbm %s5039_s3, 512  ;;  %p3889_p6 = scmp.lt.u32.totalorder %s4295_s23, %s5039_s3 }
  0xba   : > { %p3886_p4 = pnand %p3884_p0, %p3855_p9  ;;  %p3890_p3 = scmp.lt.u32.totalorder %s3888_s19, %s3883_s2 }
  0xbb   : > { %p3892_p7 = scmp.lt.u32.totalorder %s3883_s2, %s4295_s23 }
  0xbc   : > { %p3887_p8 = pneg %p3886_p4  ;;  %p3891_p5 = por %p3890_p3, %p3889_p6 }
  0xbe   : > { %p3893_p12 = por %p3892_p7, %p3891_p5 }
  0xc0   : > { %p3894_p1 = pnand %p3893_p12, %p3887_p8 }
  0xc2   : > { %3897 = shalt.err (!%p3894_p1)
}
  0xc3   : > { %s3898_s13 = scalar_lea.vmem %s4331_s9, 256  ;;  %s4006_s29 = smov [#allocation5]  }
  0xc4   : > { %p3899_p2 = scmp.ne.s32.totalorder %s4331_s9, %s3898_s13  ;;  %s3903_s24 = sshll.u32 %s4006_s29, 4  ;;  %s3904_s24 = int_to_ptr.vmem [resolvable:$false] %s3903_s24 }
  0xc5   : > { %s3905_s21 = scalar_lea.vmem %s3904_s24, 512  ;;  %p3906_p4 = scmp.lt.s32.totalorder %s4331_s9, %s3904_s24 }
  0xc6   : > { %p3901_p13 = pnand %p3899_p2, %p3855_p9  ;;  %p3907_p6 = scmp.lt.s32.totalorder %s3905_s21, %s3898_s13 }
  0xc8   : > { %p3902_p0 = pneg %p3901_p13  ;;  %p3908_p3 = por %p3907_p6, %p3906_p4 }
  0xca   : > { %p3909_p5 = pnand %p3908_p3, %p3902_p0 }
  0xcc   : > { %3912 = shalt.err (!%p3909_p5)
}
  0xcd   : > { %3540 = dma.hbm_to_vmem [thread:$0]  (!%p4288_p11), %s4295_s23, 256, %s4331_s9, %s4334_s17, %s5033_s10, %s5033_s10, %s5032_s22  }
  0xce   : > { %p5040_p9 = scmp.ne.s32.totalorder %s5025_s18, 0 }
  0xcf   : > { %s4366_s16 = sand.u32 (!%p5040_p9), 1, %s3987_s25   ;;  %p5041_p8 = scmp.ne.s32.totalorder (!%p5040_p9), %s5022_s0, 0 }
  0xd0   : > { %578 = sbr.rel (%p5040_p9) target bundleno = 4578 (0x11e2), region = 88  ;;  %s4369_s2 = sshll.u32 (!%p5040_p9), %s4366_s16, 4 }
  0xd1   : > { %s581_s20 = scalar_lea.sflag (!%p5040_p9), [#allocation3], %s4366_s16  ;;  %s584_s11 = scalar_lea.vmem (!%p5040_p9), [#allocation2], %s4369_s2 }
  0xd7   : > { %3958 = dma.done.wait (%p5041_p8), %s581_s20, 256  }
  0xd8   : > { %3960 = vsyncadd (%p5041_p8), %s581_s20, 4294967040  ;;  %s589_s9 = sand.u32 1, %s4124_s28   ;;  %s4379_s22 = scalar_lea.vmem [#allocation5], %s4369_s2 }
  0xd9   : > { %s590_s18 = scalar_lea.sflag [#allocation6], %s589_s9 }
  0xda   : > { %3962 = dma.done.wait (%p5041_p8), %s590_s18, 256  }
  0xdb   : > { %3964 = vsyncadd (%p5041_p8), %s590_s18, 4294967040  ;;  %p5042_p11 = scmp.eq.s32.totalorder %s4124_s28, 0 }
  0xdd   : > { %3966 = dma.done.wait (%p5042_p11), [#allocation6], 256   ;;  %p5043_p7 = pmov %p5042_p11 }
  0xdf   : > { %3968 = vsyncadd (%p5043_p7), [#allocation6], 4294967040  ;;  %p5044_p12 = pmov %p5043_p7 }
  0xe0   : > { %p5045_p1 = pmov %p5043_p7 }
  0xe1   : > { %3970 = dma.done.wait (%p5044_p12), [#allocation9], 1280  }
  0xe2   : > { %3972 = vsyncadd (%p5045_p1), [#allocation9], 4294966016  ;;  %p5046_p2 = pmov %p5045_p1 }
  0xe3   : > { %p5047_p13 = pmov %p5045_p1 }
  0xe4   : > { %3974 = dma.done.wait (%p5046_p2), [#allocation12], 512  }
  0xe5   : > { %3976 = vsyncadd (%p5047_p13), [#allocation12], 4294966784  ;;  %vm674_vm0 = vcmask 130048   ;;  %v668_v0 = vld [vmem:[%s584_s11] sm:$0xff]  ;;  %v669_v1 = vld [vmem:[%s584_s11 + $0x8] sm:$0xff]  ;;  %vm848_vm1 = vcmask 261120  }
  0xe6   : > { %v672_v2 = vld [vmem:[#allocation7] sm:$0xff]  ;;  %v3339_v3 = vpack.c.bf16 %v669_v1, %v668_v0  ;;  %v756_v4 = vld [vmem:[#allocation8] sm:$0xff]  ;;  %v2868_v6 = vld [vmem:[%s4979_s4 + $0x28] sm:$0xff]  ;;  %v4007_v60 = vmov 0.0   ;;  %vm1389_vm2 = vcmask 64512   ;;  %vm4009_vm3 = vmmov 0  }
  0xe7   : > { %3082 = vmatprep.mubr.msk.f32.mxu0 %vm674_vm0, %v672_v2  ;;  %3089 = vmatprep.mubr.msk.f32.mxu1 %vm674_vm0, %v756_v4  ;;  %v2867_v5 = vld [vmem:[%s4979_s4 + $0x20] sm:$0xff]  ;;  %v2869_v7 = vld [vmem:[%s4979_s4 + $0x30] sm:$0xff]  ;;  %v2870_v9 = vld [vmem:[%s4979_s4 + $0x38] sm:$0xff]  ;;  %s5048_s0 = sld [smem:[#allocation29_spill]]  ;;  %s5049_s17 = sld [smem:[#allocation30_spill]] }
  0xe8   : > { %3340 = vmatprep.subr.bf16.mxu0 %v3339_v3  ;;  %3344 = vmatprep.subr.bf16.mxu1 %v3339_v3  ;;  %v3347_v8 = vpack.c.bf16 %v2868_v6, %v2867_v5  ;;  %v673_v10 = vld [vmem:[#allocation7 + $0x8] sm:$0xff]  ;;  %v757_v11 = vld [vmem:[#allocation8 + $0x8] sm:$0xff]  ;;  %v3351_v12 = vpack.c.bf16 %v2870_v9, %v2869_v7  ;;  %v839_v13 = vld [vmem:[%s4979_s4] sm:$0xff]  ;;  %s5050_s26 = sld [smem:[#allocation31_spill]]  ;;  %s5051_s29 = sld [smem:[#allocation33_spill]] }
  0xe9   : > { %3342 = vmatpush3.bf16.msra.mxu0 %v3339_v3  ;;  %3346 = vmatpush3.bf16.msra.mxu1 %v3339_v3  ;;  %v840_v14 = vld [vmem:[%s4979_s4 + $0x8] sm:$0xff]  ;;  %v841_v16 = vld [vmem:[%s4979_s4 + $0x10] sm:$0xff]  ;;  %v842_v17 = vld [vmem:[%s4979_s4 + $0x18] sm:$0xff]  ;;  %s5052_s21 = sld [smem:[#allocation34_spill]]  ;;  %s5053_s9 = sld [smem:[#allocation35_spill]] }
  0xea   : > { %3348 = vmatprep.subr.bf16.mxu0 %v3347_v8  ;;  %v3355_v15 = vpack.c.bf16 %v840_v14, %v839_v13  ;;  %v3359_v18 = vpack.c.bf16 %v842_v17, %v841_v16  ;;  %v2875_v19 = vld [vmem:[%s4979_s4 + $0x40] sm:$0xff]  ;;  %v2876_v20 = vld [vmem:[%s4979_s4 + $0x48] sm:$0xff]  ;;  %v2877_v22 = vld [vmem:[%s4979_s4 + $0x50] sm:$0xff]  ;;  %s664_s18 = scalar_lea.vmem [#allocation13], %s4369_s2  ;;  %s2939_s2 = sshll.u32 %s4124_s28, 8 }
  0xeb   : > { %v3363_v21 = vpack.c.bf16 %v2876_v20, %v2875_v19  ;;  %v2878_v23 = vld [vmem:[%s4979_s4 + $0x58] sm:$0xff]  ;;  %v2881_v29 = vld [vmem:[%s4980_s5] ss:$0 sm:$0xff]  ;;  %v1156_v48 = vld [vmem:[%s4983_s8 + $0x8] sm:$0xff]  ;;  %s2708_s10 = sshll.u32 %s664_s18, 4  ;;  %s5054_s30 = sld [smem:[#allocation36_spill]]  ;;  %s4930_s10 = int_to_ptr.vmem [resolvable:$true] %s2708_s10 }
  0xec   : > { %3083 = vmatmul.mubr.msk.f32.vlgmr.msra.gmra.mrb[0].mxu0 %vm674_vm0, %v673_v10  ;;  %3090 = vmatmul.mubr.msk.f32.vlgmr.msra.gmra.mrb[0].mxu1 %vm674_vm0, %v757_v11  ;;  %v3367_v27 = vpack.c.bf16 %v2878_v23, %v2877_v22  ;;  %v1158_v49 = vld [vmem:[%s4983_s8 + $0x18] sm:$0xff]  ;;  %v1155_v51 = vld [vmem:[%s4983_s8] sm:$0xff]  ;;  %v1157_v52 = vld [vmem:[%s4983_s8 + $0x10] sm:$0xff]  ;;  %s3913_s14 = scalar_lea.vmem %s4930_s10, 256  ;;  %s4010_s28 = smov [#allocation13]  }
  0xed   : > { %3350 = vmatpush3.bf16.msra.mxu0 %v3347_v8  ;;  %3100 = vmatprep.mubr.msk.f32.mxu0 %vm848_vm1, %v668_v0  ;;  %v3371_v50 = vpack.c.bf16 %v1158_v49, %v1156_v48  ;;  %v3373_v53 = vpack.c.bf16 %v1157_v52, %v1155_v51  ;;  %v1160_v54 = vld [vmem:[%s4983_s8 + $0x28] sm:$0xff]  ;;  %v1162_v55 = vld [vmem:[%s4983_s8 + $0x38] sm:$0xff]  ;;  %v1159_v57 = vld [vmem:[%s4983_s8 + $0x20] sm:$0xff]  ;;  %p3914_p0 = scmp.ne.s32.totalorder %s4930_s10, %s3913_s14  ;;  %s3917_s13 = sshll.u32 %s4010_s28, 4  ;;  %s3918_s13 = int_to_ptr.vmem [resolvable:$false] %s3917_s13 }
  0xee   : > { %3352 = vmatprep.subr.bf16.mxu0 %v3351_v12  ;;  %v3375_v56 = vpack.c.bf16 %v1162_v55, %v1160_v54  ;;  %v1161_v58 = vld [vmem:[%s4983_s8 + $0x30] sm:$0xff]  ;;  %1233 = vmatprep.mubr.f32.mxu1 %v4007_v60  ;;  %v1247_v61 = vld [vmem:[#allocation10 + $0x8] sm:$0xff]  ;;  %v1249_v62 = vld [vmem:[#allocation10 + $0x18] sm:$0xff]  ;;  %p3920_p3 = scmp.lt.s32.totalorder %s4930_s10, %s3918_s13 }
  0xef   : > { %3372 = vmatprep.subr.bf16.mxu1 %v3371_v50  ;;  %v3377_v59 = vpack.c.bf16 %v1161_v58, %v1159_v57  ;;  %v3379_v63 = vpack.c.bf16 %v1249_v62, %v1247_v61  ;;  %v2882_v7 = vld [vmem:[%s4981_s6] ss:$0 sm:$0xff]  ;;  %v1248_v10 = vld [vmem:[#allocation10 + $0x10] sm:$0xff]  ;;  %v1253_v13 = vld [vmem:[#allocation10 + $0x38] sm:$0xff]  ;;  %p3915_p4 = pnand %p3914_p0, %p4271_p10 }
  0xf0   : > { %3374 = vmatpush1.bf16.msra.mxu1 %v3373_v53  ;;  %v1246_v9 = vld [vmem:[#allocation10] sm:$0xff] }
  0xf1   : > { %3354 = vmatpush3.bf16.msra.mxu0 %v3351_v12  ;;  %3376 = vmatprep.subr.bf16.mxu1 %v3375_v56  ;;  %v2883_v11 = vld [vmem:[%s4982_s7] ss:$0 sm:$0xff]  ;;  %v1251_v12 = vld [vmem:[#allocation10 + $0x28] sm:$0xff]  ;;  %v3381_v16 = vpack.c.bf16 %v1248_v10, %v1246_v9  ;;  %s4928_s19 = scalar_lea.hbm %s5054_s30, %s2939_s2  ;;  %p3916_p6 = pneg %p3915_p4 }
  0xf2   : > { %3356 = vmatprep.subr.bf16.mxu0 %v3355_v15  ;;  %v3383_v19 = vpack.c.bf16 %v1253_v13, %v1251_v12  ;;  %v1250_v20 = vld [vmem:[#allocation10 + $0x20] sm:$0xff] }
  0xf4   : > { %3101 = vmatmul.mubr.msk.f32.vlgmr.msra.gmra.mrb[2].mxu0 %vm848_vm1, %v669_v1  ;;  %3378 = vmatpush1.bf16.msra.mxu1 %v3377_v59 }
  0xf5   : > { %3358 = vmatpush3.bf16.msra.mxu0 %v3355_v15  ;;  %3380 = vmatprep.subr.bf16.mxu1 %v3379_v63 }
  0xf6   : > { %3360 = vmatprep.subr.bf16.mxu0 %v3359_v18 }
  0xf9   : > { %3362 = vmatpush3.bf16.msra.mxu0 %v3359_v18 }
  0xfa   : > { %3364 = vmatprep.subr.bf16.mxu0 %v3363_v21 }
 0x1bf   : > { %v3084_v24 = vpop.f32.mrb[0].mxu0  ;;  %v3091_v25 = vpop.f32.mrb[0].mxu1 }
 0x1c0   : > { %v747_v26 = vpop.f32.mrb[1].mxu0  ;;  %v830_v28 = vpop.f32.mrb[1].mxu1 }
 0x1c1   : > { %3111 = vmatprep.mubr.msk.f32.mxu0 %vm848_vm1, %v747_v26  ;;  %v671_v26 = vld [vmem:[%s4379_s22 + $0x8] sm:$0xff] }
 0x1c2   : > { %3112 = vmatmul.mubr.msk.f32.vlgmr.msra.gmra.mrb[2].mxu0 %vm848_vm1, %v3084_v24 }
 0x1c3   : > { %3366 = vmatpush3.bf16.msra.mxu0 %v3363_v21  ;;  %3122 = vmatprep.mubr.msk.f32.mxu0 %vm848_vm1, %v830_v28  ;;  %v1252_v21 = vld [vmem:[#allocation10 + $0x30] sm:$0xff] }
 0x1c4   : > { %3368 = vmatprep.subr.bf16.mxu0 %v3367_v27  ;;  %v3385_v23 = vpack.c.bf16 %v1252_v21, %v1250_v20 }
 0x1c7   : > { %3370 = vmatpush3.bf16.msra.mxu0 %v3367_v27 }
 0x1ca   : > { %3123 = vmatmul.mubr.msk.f32.vlgmr.msra.gmra.mrb[2].mxu0 %vm848_vm1, %v3091_v25  ;;  %v4486_v25 = vld [vmem:[%s4379_s22] sm:$0xff] }
 0x1cb   : > { %3183 = vmatprep.mubr.msk.f32.mxu0 %vm4009_vm3, %v4007_v60 }
 0x29d   : > { %v3124_v30 = vpop.f32.mrb[2].mxu0 }
 0x29e   : > { %v1088_v31 = vpop.f32.mrb[3].mxu0  ;;  %v1107_v32 = vadd.f32 %v3124_v30, %v2881_v29 }
 0x29f   : > { %v1106_v33 = vadd.f32 %v2881_v29, %v1088_v31 }
 0x2a0   : > { %v1109_v35 = vmax.f32 %v1107_v32, 0.0 }
 0x2a1   : > { %v1108_v34 = vmax.f32 %v1106_v33, 0.0 }
 0x2a2   : > { %v1115_v37 = vsel %vm848_vm1, %v1109_v35, 0.0 }
 0x2a3   : > { %v1112_v36 = vsel %vm848_vm1, %v1108_v34, 0.0 }
 0x2a4   : > { %1113 = vadd.xlane.f32.xlu0 %v1112_v36 }
 0x2a8   : > { %1116 = vadd.xlane.f32.xlu0 %v1115_v37 }
 0x331   : > { %v1114_v38 = vpop.xlane.xlu0 %1113 }
 0x332   : > { %v1119_v39 = vmul.f32 0.03125, %v1114_v38 }
 0x334   : > { %v1121_v40 = vsub.f32 %v1108_v34, %v1119_v39 }
 0x335   : > { %v1117_v41 = vpop.xlane.xlu0 %1116 }
 0x336   : > { %v1120_v42 = vmul.f32 0.03125, %v1117_v41  ;;  %v1123_v43 = vmul.f32 %v1121_v40, %v1121_v40 }
 0x338   : > { %v1122_v44 = vsub.f32 %v1109_v35, %v1120_v42  ;;  %v1125_v45 = vsel %vm848_vm1, %v1123_v43, 0.0 }
 0x339   : > { %1126 = vadd.xlane.f32.xlu1 %v1125_v45 }
 0x33a   : > { %v1124_v46 = vmul.f32 %v1122_v44, %v1122_v44 }
 0x33c   : > { %v1128_v47 = vsel %vm848_vm1, %v1124_v46, 0.0 }
 0x33d   : > { %1129 = vadd.xlane.f32.xlu1 %v1128_v47 }
 0x3c6   : > { %v1127_v0 = vpop.xlane.xlu1 %1126 }
 0x3c7   : > { %v1131_v1 = vmul.f32 0.03125, %v1127_v0 }
 0x3c9   : > { %v1133_v2 = vadd.f32 1e-05, %v1131_v1 }
 0x3ca   : > { %v1130_v3 = vpop.xlane.xlu1 %1129 }
 0x3cb   : > { %3600 = vrsqrt.f32 %v1133_v2  ;;  %v1132_v4 = vmul.f32 0.03125, %v1130_v3 }
 0x3cd   : > { %v1134_v5 = vadd.f32 1e-05, %v1132_v4 }
 0x3cf   : > { %3602 = vrsqrt.f32 %v1134_v5 }
 0x3d5   : > { %v3601_v6 = vpop.eup %3600 }
 0x3d6   : > { %v1137_v8 = vmul.f32 %v3601_v6, %v1121_v40 }
 0x3d8   : > { %v1145_v14 = vmul.f32 %v2882_v7, %v1137_v8 }
 0x3d9   : > { %v3603_v15 = vpop.eup %3602 }
 0x3da   : > { %v1153_v17 = vadd.f32 %v2883_v11, %v1145_v14  ;;  %v1138_v18 = vmul.f32 %v3603_v15, %v1122_v44 }
 0x3dc   : > { %2884 = vmatmul.mubr.msk.f32.vlgmr.msra.gmra.mrb[2].mxu1 %vm848_vm1, %v1153_v17  ;;  %v1146_v22 = vmul.f32 %v2882_v7, %v1138_v18 }
 0x3dd   : > { %1239 = vmatprep.mubr.f32.mxu1 %v4007_v60  ;;  %3382 = vmatpush1.bf16.msra.mxu1 %v3381_v16 }
 0x3de   : > { %v1154_v24 = vadd.f32 %v2883_v11, %v1146_v22  ;;  %3384 = vmatprep.subr.bf16.mxu1 %v3383_v19 }
 0x3e0   : > { %2885 = vmatmul.mubr.msk.f32.gmra.mrb[4].mxu1 %vm848_vm1, %v1154_v24 }
 0x3e1   : > { %3386 = vmatpush1.bf16.msra.mxu1 %v3385_v23  ;;  %1324 = vmatprep.mubr.f32.mxu1 %v4007_v60 }
 0x3e4   : > { %2886 = vmatmul.mubr.msk.f32.vlgmr.msra.gmra.mrb[6].mxu1 %vm848_vm1, %v4486_v25 }
 0x3e5   : > { %1330 = vmatprep.mubr.f32.mxu1 %v4007_v60 }
 0x3e8   : > { %2887 = vmatmul.mubr.msk.f32.gmra.mrb[8].mxu1 %vm848_vm1, %v671_v26 }
 0x4af   : > { %v1235_v27 = vpop.f32.mrb[2].mxu1 }
 0x4b0   : > { %1357 = vxpose.xlu0.b32.start.end [1/1] (short) %v1235_v27, 128  ;;  %v4493_v28 = vpop.f32.mrb[3].mxu1 }
 0x4b3   : > { %v4495_v29 = vpop.f32.mrb[4].mxu1 }
 0x4b4   : > { %v4497_v30 = vpop.f32.mrb[5].mxu1 }
 0x4b7   : > { %v1326_v31 = vpop.f32.mrb[6].mxu1 }
 0x4b8   : > { %v4499_v32 = vpop.f32.mrb[7].mxu1  ;;  %3125 = vmatprep.subr.mxu1 %v1326_v31 }
 0x4b9   : > { %3126 = vmatpush3.msra.mxu1 %v1326_v31 }
 0x4bb   : > { %v4501_v33 = vpop.f32.mrb[8].mxu1 }
 0x4bc   : > { %v4503_v34 = vpop.f32.mrb[9].mxu1 }
 0x530   : > { %v1373_v35 = vpop.trf.xlu0 }
 0x531   : > { %3127 = vmatprep.mubr.msk.f32.mxu1 %vm1389_vm2, %v1373_v35 }
 0x534   : > { %v1374_v36 = vpop.trf.xlu0 }
 0x535   : > { %3128 = vmatmul.mubr.msk.f32.vlgmr.msra.gmra.mrb[10].mxu1 %vm1389_vm2, %v1374_v36 }
 0x538   : > { %v1375_v37 = vpop.trf.xlu0 }
 0x539   : > { %3130 = vmatprep.mubr.msk.f32.mxu1 %vm1389_vm2, %v1375_v37 }
 0x53c   : > { %v1376_v38 = vpop.trf.xlu0 }
 0x53d   : > { %3131 = vmatmul.mubr.msk.f32.gmra.mrb[12].mxu1 %vm1389_vm2, %v1376_v38 }
 0x540   : > { %v1377_v39 = vpop.trf.xlu0 }
 0x541   : > { %3133 = vmatprep.mubr.msk.f32.mxu1 %vm1389_vm2, %v1377_v39 }
 0x544   : > { %v1378_v40 = vpop.trf.xlu0 }
 0x545   : > { %3134 = vmatmul.mubr.msk.f32.gmra.mrb[14].mxu1 %vm1389_vm2, %v1378_v40 }
 0x548   : > { %v1379_v41 = vpop.trf.xlu0 }
 0x549   : > { %3136 = vmatprep.mubr.msk.f32.mxu1 %vm1389_vm2, %v1379_v41 }
 0x54c   : > { %v1380_v42 = vpop.trf.xlu0 }
 0x54d   : > { %3137 = vmatmul.mubr.msk.f32.gmra.mrb[16].mxu1 %vm1389_vm2, %v1380_v42 }
 0x550   : > { %v1381_v43 = vpop.trf.xlu0 }
 0x551   : > { %3139 = vmatprep.mubr.msk.f32.mxu1 %vm1389_vm2, %v1381_v43 }
 0x554   : > { %v1382_v44 = vpop.trf.xlu0 }
 0x555   : > { %3140 = vmatmul.mubr.msk.f32.gmra.mrb[18].mxu1 %vm1389_vm2, %v1382_v44 }
 0x558   : > { %v1383_v45 = vpop.trf.xlu0 }
 0x559   : > { %3142 = vmatprep.mubr.msk.f32.mxu1 %vm1389_vm2, %v1383_v45 }
 0x55c   : > { %v1384_v46 = vpop.trf.xlu0 }
 0x55d   : > { %3143 = vmatmul.mubr.msk.f32.gmra.mrb[20].mxu1 %vm1389_vm2, %v1384_v46 }
 0x560   : > { %v1385_v47 = vpop.trf.xlu0 }
 0x561   : > { %3145 = vmatprep.mubr.msk.f32.mxu1 %vm1389_vm2, %v1385_v47 }
 0x564   : > { %v1386_v48 = vpop.trf.xlu0 }
 0x565   : > { %3146 = vmatmul.mubr.msk.f32.gmra.mrb[22].mxu1 %vm1389_vm2, %v1386_v48 }
 0x568   : > { %v1387_v49 = vpop.trf.xlu0 }
 0x569   : > { %3148 = vmatprep.mubr.msk.f32.mxu1 %vm1389_vm2, %v1387_v49 }
 0x56c   : > { %v1388_v50 = vpop.trf.xlu0 }
 0x56d   : > { %3149 = vmatmul.mubr.msk.f32.gmra.mrb[24].mxu1 %vm1389_vm2, %v1388_v50 }
 0x56e   : > { %3218 = vmatprep.mubr.msk.f32.mxu1 %vm4009_vm3, %v4007_v60 }
 0x608   : > { %v3129_v51 = vpop.f32.mrb[10].mxu1 }
 0x609   : > { %v1584_v52 = vmul.f32 0.35355338, %v3129_v51  ;;  %v1504_v53 = vpop.f32.mrb[11].mxu1 }
 0x60a   : > { %v1583_v54 = vmul.f32 0.35355338, %v1504_v53 }
 0x60b   : > { %1601 = vmax.xlane.f32.xlu1 %v1584_v52 }
 0x60f   : > { %1599 = vmax.xlane.f32.xlu1 %v1583_v54 }
 0x610   : > { %v3132_v55 = vpop.f32.mrb[12].mxu1 }
 0x611   : > { %v1586_v56 = vmul.f32 0.35355338, %v3132_v55  ;;  %v1514_v57 = vpop.f32.mrb[13].mxu1 }
 0x612   : > { %v1585_v58 = vmul.f32 0.35355338, %v1514_v57 }
 0x613   : > { %1605 = vmax.xlane.f32.xlu1 %v1586_v56 }
 0x617   : > { %1603 = vmax.xlane.f32.xlu1 %v1585_v58 }
 0x618   : > { %v3135_v59 = vpop.f32.mrb[14].mxu1 }
 0x619   : > { %v1588_v61 = vmul.f32 0.35355338, %v3135_v59  ;;  %v1524_v62 = vpop.f32.mrb[15].mxu1 }
 0x61a   : > { %v1587_v63 = vmul.f32 0.35355338, %v1524_v62 }
 0x61b   : > { %1609 = vmax.xlane.f32.xlu1 %v1588_v61 }
 0x61f   : > { %1607 = vmax.xlane.f32.xlu1 %v1587_v63 }
 0x620   : > { %v3138_v0 = vpop.f32.mrb[16].mxu1 }
 0x621   : > { %v1590_v1 = vmul.f32 0.35355338, %v3138_v0  ;;  %v1534_v2 = vpop.f32.mrb[17].mxu1 }
 0x622   : > { %v4521_v3 = vmul.f32 0.35355338, %v1534_v2 }
 0x623   : > { %1613 = vmax.xlane.f32.xlu1 %v1590_v1 }
 0x627   : > { %1611 = vmax.xlane.f32.xlu1 %v4521_v3 }
 0x628   : > { %v3141_v4 = vpop.f32.mrb[18].mxu1 }
 0x629   : > { %v4524_v5 = vmul.f32 0.35355338, %v3141_v4  ;;  %v1544_v6 = vpop.f32.mrb[19].mxu1 }
 0x62a   : > { %v4527_v7 = vmul.f32 0.35355338, %v1544_v6 }
 0x62b   : > { %1617 = vmax.xlane.f32.xlu1 %v4524_v5 }
 0x62f   : > { %1615 = vmax.xlane.f32.xlu1 %v4527_v7 }
 0x630   : > { %v3144_v8 = vpop.f32.mrb[20].mxu1 }
 0x631   : > { %v1554_v9 = vpop.f32.mrb[21].mxu1  ;;  %v4533_v11 = vmul.f32 0.35355338, %v3144_v8  ;;  %v4008_v8 = vmov 0.0|0.0  }
 0x632   : > { %v4530_v10 = vmul.f32 0.35355338, %v1554_v9  ;;  %3387 = vmatprep.subr.bf16.mxu0 %v4008_v8  ;;  %3411 = vmatprep.subr.bf16.mxu1 %v4008_v8 }
 0x634   : > { %1619 = vmax.xlane.f32.xlu1 %v4530_v10 }
 0x638   : > { %1621 = vmax.xlane.f32.xlu1 %v4533_v11  ;;  %v3147_v12 = vpop.f32.mrb[22].mxu1 }
 0x639   : > { %v4536_v13 = vmul.f32 0.35355338, %v3147_v12  ;;  %v1564_v14 = vpop.f32.mrb[23].mxu1 }
 0x63a   : > { %v4538_v15 = vmul.f32 0.35355338, %v1564_v14 }
 0x63c   : > { %1625 = vmax.xlane.f32.xlu1 %v4536_v13  ;;  %1623 = vmax.xlane.f32.xlu0 %v4538_v15 }
 0x640   : > { %v3150_v16 = vpop.f32.mrb[24].mxu1 }
 0x641   : > { %v1574_v17 = vpop.f32.mrb[25].mxu1  ;;  %v4544_v19 = vmul.f32 0.35355338, %v3150_v16 }
 0x642   : > { %v4542_v18 = vmul.f32 0.35355338, %v1574_v17 }
 0x644   : > { %1627 = vmax.xlane.f32.xlu1 %v4542_v18 }
 0x648   : > { %1629 = vmax.xlane.f32.xlu1 %v4544_v19 }
 0x698   : > { %v1602_v20 = vpop.xlane.xlu1 %1601 }
 0x699   : > { %v1632_v21 = vsub.f32 %v1584_v52, %v1602_v20 }
 0x69b   : > { %v1649_v22 = vmul.f32 1.442695, %v1632_v21 }
 0x69c   : > { %v1600_v23 = vpop.xlane.xlu1 %1599 }
 0x69d   : > { %3604 = vpow2.f32 %v1649_v22  ;;  %v1631_v24 = vsub.f32 %v1583_v54, %v1600_v23 }
 0x69f   : > { %v1647_v26 = vmul.f32 1.442695, %v1631_v24 }
 0x6a0   : > { %v1606_v27 = vpop.xlane.xlu1 %1605 }
 0x6a1   : > { %3606 = vpow2.f32 %v1647_v26  ;;  %v1634_v31 = vsub.f32 %v1586_v56, %v1606_v27 }
 0x6a3   : > { %v1653_v35 = vmul.f32 1.442695, %v1634_v31 }
 0x6a4   : > { %v1604_v36 = vpop.xlane.xlu1 %1603 }
 0x6a5   : > { %3608 = vpow2.f32 %v1653_v35  ;;  %v1633_v37 = vsub.f32 %v1585_v58, %v1604_v36  ;;  %v1337_v36 = vld [vmem:[%s5048_s0] sm:$0xff] }
 0x6a7   : > { %v4548_v38 = vpop.eup %3604  ;;  %v1651_v39 = vmul.f32 1.442695, %v1633_v37  ;;  %v1338_v37 = vld [vmem:[%s5048_s0 + $0x8] sm:$0xff] }
 0x6a8   : > { %v1610_v40 = vpop.xlane.xlu1 %1609  ;;  %1681 = vadd.xlane.f32.xlu1 %v4548_v38 }
 0x6a9   : > { %3610 = vpow2.f32 %v1651_v39  ;;  %v1636_v41 = vsub.f32 %v1588_v61, %v1610_v40  ;;  %v1339_v39 = vld [vmem:[%s5048_s0 + $0x10] sm:$0xff]  ;;  %v4620_v40 = vpack.c.bf16 %v1338_v37, %v1337_v36 }
 0x6ab   : > { %v4551_v42 = vpop.eup %3606  ;;  %v1657_v43 = vmul.f32 1.442695, %v1636_v41  ;;  %v1340_v41 = vld [vmem:[%s5048_s0 + $0x18] sm:$0xff]  ;;  %3413 = vmatpush3.bf16.msra.mxu1 %v4620_v40 }
 0x6ac   : > { %v1608_v44 = vpop.xlane.xlu1 %1607  ;;  %1679 = vadd.xlane.f32.xlu1 %v4551_v42  ;;  %3414 = vmatprep.subr.bf16.mxu1 %v4008_v8 }
 0x6ad   : > { %3612 = vpow2.f32 %v1657_v43  ;;  %v1635_v45 = vsub.f32 %v1587_v63, %v1608_v44  ;;  %v4626_v43 = vpack.c.bf16 %v1340_v41, %v1339_v39  ;;  %v1341_v44 = vld [vmem:[%s5048_s0 + $0x20] sm:$0xff] }
 0x6af   : > { %v4554_v46 = vpop.eup %3608  ;;  %v1655_v47 = vmul.f32 1.442695, %v1635_v45  ;;  %v1342_v45 = vld [vmem:[%s5048_s0 + $0x28] sm:$0xff]  ;;  %3416 = vmatpush3.bf16.msra.mxu1 %v4626_v43 }
 0x6b0   : > { %v1614_v48 = vpop.xlane.xlu1 %1613  ;;  %1685 = vadd.xlane.f32.xlu1 %v4554_v46  ;;  %3417 = vmatprep.subr.bf16.mxu1 %v4008_v8 }
 0x6b1   : > { %3614 = vpow2.f32 %v1655_v47  ;;  %v1638_v49 = vsub.f32 %v1590_v1, %v1614_v48  ;;  %v4636_v47 = vpack.c.bf16 %v1342_v45, %v1341_v44  ;;  %v1343_v48 = vld [vmem:[%s5048_s0 + $0x30] sm:$0xff] }
 0x6b3   : > { %v4557_v50 = vpop.eup %3610  ;;  %v1661_v51 = vmul.f32 1.442695, %v1638_v49  ;;  %v1344_v49 = vld [vmem:[%s5048_s0 + $0x38] sm:$0xff]  ;;  %3419 = vmatpush3.bf16.msra.mxu1 %v4636_v47 }
 0x6b4   : > { %v1612_v52 = vpop.xlane.xlu1 %1611  ;;  %1683 = vadd.xlane.f32.xlu1 %v4557_v50  ;;  %3420 = vmatprep.subr.bf16.mxu1 %v4008_v8 }
 0x6b5   : > { %3616 = vpow2.f32 %v1661_v51  ;;  %v1637_v53 = vsub.f32 %v4521_v3, %v1612_v52  ;;  %v4646_v51 = vpack.c.bf16 %v1344_v49, %v1343_v48  ;;  %v1345_v52 = vld [vmem:[%s5048_s0 + $0x40] sm:$0xff] }
 0x6b7   : > { %v4561_v54 = vpop.eup %3612  ;;  %v1659_v55 = vmul.f32 1.442695, %v1637_v53  ;;  %v1346_v53 = vld [vmem:[%s5048_s0 + $0x48] sm:$0xff]  ;;  %3422 = vmatpush3.bf16.msra.mxu1 %v4646_v51 }
 0x6b8   : > { %v1618_v56 = vpop.xlane.xlu1 %1617  ;;  %1689 = vadd.xlane.f32.xlu1 %v4561_v54  ;;  %3423 = vmatprep.subr.bf16.mxu1 %v4008_v8 }
 0x6b9   : > { %3618 = vpow2.f32 %v1659_v55  ;;  %v1640_v57 = vsub.f32 %v4524_v5, %v1618_v56  ;;  %v4656_v55 = vpack.c.bf16 %v1346_v53, %v1345_v52  ;;  %v1347_v56 = vld [vmem:[%s5048_s0 + $0x50] sm:$0xff] }
 0x6bb   : > { %v4565_v58 = vpop.eup %3614  ;;  %v1665_v59 = vmul.f32 1.442695, %v1640_v57  ;;  %v1348_v57 = vld [vmem:[%s5048_s0 + $0x58] sm:$0xff]  ;;  %3425 = vmatpush3.bf16.msra.mxu1 %v4656_v55 }
 0x6bc   : > { %v1616_v61 = vpop.xlane.xlu1 %1615  ;;  %1687 = vadd.xlane.f32.xlu1 %v4565_v58  ;;  %3426 = vmatprep.subr.bf16.mxu1 %v4008_v8 }
 0x6bd   : > { %3620 = vpow2.f32 %v1665_v59  ;;  %v1639_v62 = vsub.f32 %v4527_v7, %v1616_v61  ;;  %v4666_v59 = vpack.c.bf16 %v1348_v57, %v1347_v56  ;;  %v1349_v61 = vld [vmem:[%s5048_s0 + $0x60] sm:$0xff] }
 0x6bf   : > { %v4569_v63 = vpop.eup %3616  ;;  %v1663_v0 = vmul.f32 1.442695, %v1639_v62  ;;  %v1350_v62 = vld [vmem:[%s5048_s0 + $0x68] sm:$0xff]  ;;  %3428 = vmatpush3.bf16.msra.mxu1 %v4666_v59 }
 0x6c0   : > { %1693 = vadd.xlane.f32.xlu1 %v4569_v63  ;;  %3429 = vmatprep.subr.bf16.mxu1 %v4008_v8 }
 0x6c1   : > { %3622 = vpow2.f32 %v1663_v0  ;;  %v1620_v1 = vpop.xlane.xlu1 %1619  ;;  %v4676_v0 = vpack.c.bf16 %v1350_v62, %v1349_v61 }
 0x6c2   : > { %v1641_v4 = vsub.f32 %v4530_v10, %v1620_v1  ;;  %v1351_v1 = vld [vmem:[%s5048_s0 + $0x70] sm:$0xff] }
 0x6c3   : > { %v4572_v2 = vpop.eup %3618  ;;  %3431 = vmatpush3.bf16.msra.mxu1 %v4676_v0 }
 0x6c4   : > { %1691 = vadd.xlane.f32.xlu1 %v4572_v2  ;;  %v1667_v12 = vmul.f32 1.442695, %v1641_v4  ;;  %3432 = vmatprep.subr.bf16.mxu1 %v4008_v8 }
 0x6c5   : > { %v1622_v3 = vpop.xlane.xlu1 %1621 }
 0x6c6   : > { %v1642_v5 = vsub.f32 %v4533_v11, %v1622_v3  ;;  %v1352_v3 = vld [vmem:[%s5048_s0 + $0x78] sm:$0xff] }
 0x6c7   : > { %v4577_v6 = vpop.eup %3620  ;;  %v4686_v4 = vpack.c.bf16 %v1352_v3, %v1351_v1 }
 0x6c8   : > { %v1669_v7 = vmul.f32 1.442695, %v1642_v5  ;;  %1697 = vadd.xlane.f32.xlu1 %v4577_v6 }
 0x6c9   : > { %v1626_v9 = vpop.xlane.xlu1 %1625  ;;  %v1624_v10 = vpop.xlane.xlu0 %1623  ;;  %3434 = vmatpush3.bf16.msra.mxu1 %v4686_v4 }
 0x6ca   : > { %3624 = vpow2.f32 %v1669_v7  ;;  %v1644_v14 = vsub.f32 %v4536_v13, %v1626_v9  ;;  %v1643_v17 = vsub.f32 %v4538_v15, %v1624_v10  ;;  %3435 = vmatprep.subr.bf16.mxu1 %v4008_v8 }
 0x6cb   : > { %v4583_v16 = vpop.eup %3622  ;;  %3626 = vpow2.f32 %v1667_v12 }
 0x6cc   : > { %1695 = vadd.xlane.f32.xlu1 %v4583_v16  ;;  %v1673_v11 = vmul.f32 1.442695, %v1644_v14  ;;  %v1671_v21 = vmul.f32 1.442695, %v1643_v17 }
 0x6ce   : > { %3628 = vpow2.f32 %v1673_v11 }
 0x6cf   : > { %3630 = vpow2.f32 %v1671_v21 }
 0x6d1   : > { %v1628_v20 = vpop.xlane.xlu1 %1627 }
 0x6d2   : > { %v1645_v22 = vsub.f32 %v4542_v18, %v1628_v20 }
 0x6d4   : > { %v4588_v23 = vpop.eup %3624  ;;  %v1675_v13 = vmul.f32 1.442695, %v1645_v22 }
 0x6d5   : > { %1701 = vadd.xlane.f32.xlu1 %v4588_v23  ;;  %v1630_v24 = vpop.xlane.xlu1 %1629  ;;  %v4592_v27 = vpop.eup %3626 }
 0x6d6   : > { %v1646_v26 = vsub.f32 %v4544_v19, %v1630_v24  ;;  %3632 = vpow2.f32 %v1675_v13 }
 0x6d8   : > { %v1677_v15 = vmul.f32 1.442695, %v1646_v26  ;;  %v4595_v31 = vpop.eup %3628 }
 0x6d9   : > { %1699 = vadd.xlane.f32.xlu1 %v4592_v27  ;;  %v4598_v18 = vpop.eup %3630 }
 0x6da   : > { %3634 = vpow2.f32 %v1677_v15 }
 0x6dd   : > { %1705 = vadd.xlane.f32.xlu1 %v4595_v31 }
 0x6e0   : > { %v4601_v35 = vpop.eup %3632 }
 0x6e1   : > { %1703 = vadd.xlane.f32.xlu1 %v4598_v18 }
 0x6e4   : > { %v4604_v19 = vpop.eup %3634 }
 0x6e5   : > { %1707 = vadd.xlane.f32.xlu1 %v4601_v35 }
 0x6e9   : > { %1709 = vadd.xlane.f32.xlu1 %v4604_v19 }
 0x735   : > { %v1682_v5 = vpop.xlane.xlu1 %1681 }
 0x736   : > { %3636 = vrcp.f32 %v1682_v5 }
 0x739   : > { %v1680_v7 = vpop.xlane.xlu1 %1679 }
 0x73a   : > { %3638 = vrcp.f32 %v1680_v7 }
 0x73d   : > { %v1686_v9 = vpop.xlane.xlu1 %1685 }
 0x73e   : > { %3640 = vrcp.f32 %v1686_v9 }
 0x740   : > { %v3637_v14 = vpop.eup %3636 }
 0x741   : > { %v1684_v12 = vpop.xlane.xlu1 %1683  ;;  %v1728_v20 = vmul.f32 %v3637_v14, %v4548_v38 }
 0x742   : > { %3642 = vrcp.f32 %v1684_v12 }
 0x744   : > { %v3639_v10 = vpop.eup %3638 }
 0x745   : > { %v1690_v11 = vpop.xlane.xlu1 %1689  ;;  %v1727_v17 = vmul.f32 %v3639_v10, %v4551_v42 }
 0x746   : > { %3644 = vrcp.f32 %v1690_v11 }
 0x747   : > { %v3388_v21 = vpack.c.bf16 %v1728_v20, %v1727_v17 }
 0x748   : > { %v3641_v24 = vpop.eup %3640 }
 0x749   : > { %3389 = vmatpush3.bf16.xpose.msra.mxu0 %v3388_v21  ;;  %v1688_v22 = vpop.xlane.xlu1 %1687  ;;  %v1730_v36 = vmul.f32 %v3641_v24, %v4554_v46 }
 0x74a   : > { %3646 = vrcp.f32 %v1688_v22  ;;  %3390 = vmatprep.subr.bf16.mxu0 %v4008_v8 }
 0x74c   : > { %v3643_v13 = vpop.eup %3642 }
 0x74d   : > { %v1694_v26 = vpop.xlane.xlu1 %1693  ;;  %v1729_v15 = vmul.f32 %v3643_v13, %v4557_v50 }
 0x74e   : > { %3648 = vrcp.f32 %v1694_v26 }
 0x74f   : > { %v3391_v37 = vpack.c.bf16 %v1730_v36, %v1729_v15 }
 0x750   : > { %v3645_v39 = vpop.eup %3644 }
 0x751   : > { %3392 = vmatpush3.bf16.xpose.msra.mxu0 %v3391_v37  ;;  %v1692_v42 = vpop.xlane.xlu1 %1691  ;;  %v1732_v45 = vmul.f32 %v3645_v39, %v4561_v54 }
 0x752   : > { %3650 = vrcp.f32 %v1692_v42  ;;  %3393 = vmatprep.subr.bf16.mxu0 %v4008_v8 }
 0x754   : > { %v3647_v38 = vpop.eup %3646 }
 0x755   : > { %v1698_v41 = vpop.xlane.xlu1 %1697  ;;  %v1731_v44 = vmul.f32 %v3647_v38, %v4565_v58 }
 0x756   : > { %3652 = vrcp.f32 %v1698_v41 }
 0x757   : > { %v3394_v48 = vpack.c.bf16 %v1732_v45, %v1731_v44  ;;  %v4756_v45 = vld [vmem:[%s5050_s26] ss:$0 sm:$0xff]  ;;  %s2695_s26 = scalar_lea.sflag [#allocation4], %s4366_s16 }
 0x758   : > { %v3649_v49 = vpop.eup %3648 }
 0x759   : > { %3395 = vmatpush3.bf16.xpose.msra.mxu0 %v3394_v48  ;;  %v1696_v50 = vpop.xlane.xlu1 %1695  ;;  %v1734_v53 = vmul.f32 %v3649_v49, %v4569_v63 }
 0x75a   : > { %3654 = vrcp.f32 %v1696_v50  ;;  %3396 = vmatprep.subr.bf16.mxu0 %v4008_v8 }
 0x75c   : > { %v3651_v46 = vpop.eup %3650 }
 0x75d   : > { %v1733_v52 = vmul.f32 %v3651_v46, %v4572_v2 }
 0x75f   : > { %v3397_v56 = vpack.c.bf16 %v1734_v53, %v1733_v52 }
 0x760   : > { %v3653_v57 = vpop.eup %3652 }
 0x761   : > { %3398 = vmatpush3.bf16.xpose.msra.mxu0 %v3397_v56  ;;  %v1736_v62 = vmul.f32 %v3653_v57, %v4577_v6 }
 0x762   : > { %v1702_v61 = vpop.xlane.xlu1 %1701  ;;  %3399 = vmatprep.subr.bf16.mxu0 %v4008_v8 }
 0x763   : > { %3656 = vrcp.f32 %v1702_v61 }
 0x764   : > { %v3655_v54 = vpop.eup %3654 }
 0x765   : > { %v1735_v58 = vmul.f32 %v3655_v54, %v4583_v16 }
 0x766   : > { %v1700_v1 = vpop.xlane.xlu1 %1699 }
 0x767   : > { %3658 = vrcp.f32 %v1700_v1  ;;  %v3400_v3 = vpack.c.bf16 %v1736_v62, %v1735_v58 }
 0x769   : > { %3401 = vmatpush3.bf16.xpose.msra.mxu0 %v3400_v3 }
 0x76a   : > { %v1706_v5 = vpop.xlane.xlu1 %1705  ;;  %3402 = vmatprep.subr.bf16.mxu0 %v4008_v8 }
 0x76b   : > { %3660 = vrcp.f32 %v1706_v5 }
 0x76d   : > { %v3657_v2 = vpop.eup %3656 }
 0x76e   : > { %v1704_v63 = vpop.xlane.xlu1 %1703  ;;  %v1738_v14 = vmul.f32 %v3657_v2, %v4588_v23 }
 0x76f   : > { %3662 = vrcp.f32 %v1704_v63 }
 0x771   : > { %v3659_v7 = vpop.eup %3658 }
 0x772   : > { %v1708_v9 = vpop.xlane.xlu1 %1707  ;;  %v1737_v12 = vmul.f32 %v3659_v7, %v4592_v27 }
 0x773   : > { %3664 = vrcp.f32 %v1708_v9 }
 0x774   : > { %v3403_v16 = vpack.c.bf16 %v1738_v14, %v1737_v12 }
 0x775   : > { %v3661_v10 = vpop.eup %3660 }
 0x776   : > { %3404 = vmatpush3.bf16.xpose.msra.mxu0 %v3403_v16  ;;  %v1710_v6 = vpop.xlane.xlu1 %1709  ;;  %v1740_v20 = vmul.f32 %v3661_v10, %v4595_v31  ;;  %v1354_v31 = vld [vmem:[#allocation11 + $0x8] sm:$0xff] }
 0x777   : > { %3666 = vrcp.f32 %v1710_v6  ;;  %3405 = vmatprep.subr.bf16.mxu0 %v4008_v8 }
 0x779   : > { %v3663_v11 = vpop.eup %3662 }
 0x77a   : > { %v1739_v17 = vmul.f32 %v3663_v11, %v4598_v18 }
 0x77c   : > { %v3406_v21 = vpack.c.bf16 %v1740_v20, %v1739_v17 }
 0x77d   : > { %v3665_v22 = vpop.eup %3664 }
 0x77e   : > { %3407 = vmatpush3.bf16.xpose.msra.mxu0 %v3406_v21  ;;  %v1741_v23 = vmul.f32 %v3665_v22, %v4601_v35  ;;  %v1355_v35 = vld [vmem:[#allocation11 + $0x10] sm:$0xff] }
 0x77f   : > { %3408 = vmatprep.subr.bf16.mxu0 %v4008_v8 }
 0x781   : > { %v3667_v27 = vpop.eup %3666 }
 0x782   : > { %v1742_v24 = vmul.f32 %v3667_v27, %v4604_v19  ;;  %v1356_v19 = vld [vmem:[#allocation11 + $0x18] sm:$0xff] }
 0x784   : > { %v3409_v13 = vpack.c.bf16 %v1742_v24, %v1741_v23 }
 0x786   : > { %3410 = vmatpush3.bf16.xpose.msra.mxu0 %v3409_v13 }
 0x787   : > { %3465 = vmatprep.subr.bf16.mxu0 %v4008_v8 }
 0x78d   : > { %3184 = vmatmul.mubr.f32.vlgmr.msra.gmra.mrb[4].mxu0 %v4499_v32  ;;  %v1353_v32 = vld [vmem:[#allocation11] sm:$0xff] }
 0x78e   : > { %3467 = vmatpush3.bf16.msra.mxu0 %v4620_v40  ;;  %3325 = vmatprep.mubr.msk.f32.mxu0 %vm4009_vm3, %v4007_v60  ;;  %v4734_v18 = vpack.c.bf16 %v1354_v31, %v1353_v32 }
 0x78f   : > { %3468 = vmatprep.subr.bf16.mxu0 %v4008_v8 }
 0x792   : > { %3470 = vmatpush3.bf16.msra.mxu0 %v4626_v43 }
 0x793   : > { %3471 = vmatprep.subr.bf16.mxu0 %v4008_v8 }
 0x796   : > { %3473 = vmatpush3.bf16.msra.mxu0 %v4636_v47  ;;  %v4737_v47 = vpack.c.bf16 %v1356_v19, %v1355_v35 }
 0x797   : > { %3474 = vmatprep.subr.bf16.mxu0 %v4008_v8 }
 0x79a   : > { %3476 = vmatpush3.bf16.msra.mxu0 %v4646_v51 }
 0x79b   : > { %3477 = vmatprep.subr.bf16.mxu0 %v4008_v8 }
 0x79e   : > { %3479 = vmatpush3.bf16.msra.mxu0 %v4656_v55 }
 0x79f   : > { %3480 = vmatprep.subr.bf16.mxu0 %v4008_v8 }
 0x7a2   : > { %3482 = vmatpush3.bf16.msra.mxu0 %v4666_v59 }
 0x7a3   : > { %3483 = vmatprep.subr.bf16.mxu0 %v4008_v8 }
 0x7a6   : > { %3485 = vmatpush3.bf16.msra.mxu0 %v4676_v0 }
 0x7a7   : > { %3486 = vmatprep.subr.bf16.mxu0 %v4008_v8 }
 0x7aa   : > { %3488 = vmatpush3.bf16.msra.mxu0 %v4686_v4 }
 0x7ab   : > { %3489 = vmatprep.subr.bf16.mxu0 %v4008_v8 }
 0x860   : > { %v1809_v40 = vpop.f32.mrb[4].mxu0 }
 0x861   : > { %v3185_v43 = vpop.f32.mrb[5].mxu0  ;;  %3219 = vmatmul.mubr.f32.vlgmr.msra.gmra.mrb[26].mxu1 %v1809_v40 }
 0x862   : > { %3437 = vmatpush3.bf16.msra.mxu1 %v4734_v18  ;;  %3229 = vmatprep.mubr.msk.f32.mxu1 %vm4009_vm3, %v4007_v60 }
 0x863   : > { %3438 = vmatprep.subr.bf16.mxu1 %v4008_v8 }
 0x866   : > { %3440 = vmatpush3.bf16.msra.mxu1 %v4737_v47 }
 0x867   : > { %3232 = vmatprep.subr.mxu1 %v4501_v33 }
 0x934   : > { %v1879_v51 = vpop.f32.mrb[26].mxu1 }
 0x935   : > { %v1883_v55 = vadd.f32 %v1879_v51, %v4486_v25  ;;  %v3220_v59 = vpop.f32.mrb[27].mxu1  ;;  %v4751_v25 = vld [vmem:[%s5049_s17] ss:$0 sm:$0xff] }
 0x937   : > { %v1886_v0 = vsel %vm848_vm1, %v1883_v55, 0.0 }
 0x938   : > { %1887 = vadd.xlane.f32.xlu1 %v1886_v0 }
 0x9c5   : > { %v1888_v4 = vpop.xlane.xlu1 %1887 }
 0x9c6   : > { %v1889_v26 = vmul.f32 0.03125, %v1888_v4 }
 0x9c8   : > { %v1890_v15 = vsub.f32 %v1883_v55, %v1889_v26 }
 0x9ca   : > { %v1891_v36 = vmul.f32 %v1890_v15, %v1890_v15 }
 0x9cc   : > { %v1892_v37 = vsel %vm848_vm1, %v1891_v36, 0.0 }
 0x9cd   : > { %1893 = vadd.xlane.f32.xlu1 %v1892_v37 }
 0xa00   : > { %2026 = vxpose.xlu1.b32.start.end [1/1] (short) %v4495_v29, 128 }
 0xa5a   : > { %v1894_v42 = vpop.xlane.xlu1 %1893 }
 0xa5b   : > { %v1895_v39 = vmul.f32 0.03125, %v1894_v42 }
 0xa5d   : > { %v1896_v38 = vadd.f32 1e-05, %v1895_v39 }
 0xa5f   : > { %3668 = vrsqrt.f32 %v1896_v38 }
 0xa69   : > { %v3669_v41 = vpop.eup %3668 }
 0xa6a   : > { %v1898_v44 = vmul.f32 %v3669_v41, %v1890_v15 }
 0xa6c   : > { %v1905_v48 = vmul.f32 %v4751_v25, %v1898_v44 }
 0xa6e   : > { %v1912_v29 = vadd.f32 %v4756_v45, %v1905_v48 }
 0xa70   : > { %3230 = vmatmul.mubr.msk.f32.vlgmr.msra.gmra.mrb[28].mxu1 %vm848_vm1, %v1912_v29 }
 0xa71   : > { %3233 = vmatpush3.msra.mxu1 %v4501_v33 }
 0xa72   : > { %3441 = vmatprep.subr.bf16.mxu1 %v4008_v8 }
 0xa80   : > { %v2042_v50 = vpop.trf.xlu1 }
 0xa81   : > { %3234 = vmatprep.mubr.msk.f32.mxu1 %vm1389_vm2, %v2042_v50 }
 0xa84   : > { %v2043_v49 = vpop.trf.xlu1 }
 0xa85   : > { %3235 = vmatmul.mubr.msk.f32.vlgmr.msra.gmra.mrb[30].mxu1 %vm1389_vm2, %v2043_v49 }
 0xa88   : > { %v2044_v46 = vpop.trf.xlu1 }
 0xa89   : > { %3237 = vmatprep.mubr.msk.f32.mxu1 %vm1389_vm2, %v2044_v46 }
 0xa8c   : > { %v2045_v52 = vpop.trf.xlu1 }
 0xa8d   : > { %3238 = vmatmul.mubr.msk.f32.gmra.mrb[32].mxu1 %vm1389_vm2, %v2045_v52 }
 0xa90   : > { %v2046_v53 = vpop.trf.xlu1 }
 0xa91   : > { %3240 = vmatprep.mubr.msk.f32.mxu1 %vm1389_vm2, %v2046_v53 }
 0xa94   : > { %v2047_v56 = vpop.trf.xlu1 }
 0xa95   : > { %3241 = vmatmul.mubr.msk.f32.gmra.mrb[34].mxu1 %vm1389_vm2, %v2047_v56 }
 0xa98   : > { %v2048_v33 = vpop.trf.xlu1 }
 0xa99   : > { %3243 = vmatprep.mubr.msk.f32.mxu1 %vm1389_vm2, %v2048_v33 }
 0xa9c   : > { %v2049_v57 = vpop.trf.xlu1 }
 0xa9d   : > { %3244 = vmatmul.mubr.msk.f32.gmra.mrb[36].mxu1 %vm1389_vm2, %v2049_v57 }
 0xaa0   : > { %v2050_v61 = vpop.trf.xlu1 }
 0xaa1   : > { %3246 = vmatprep.mubr.msk.f32.mxu1 %vm1389_vm2, %v2050_v61 }
 0xaa4   : > { %v2051_v54 = vpop.trf.xlu1 }
 0xaa5   : > { %3247 = vmatmul.mubr.msk.f32.gmra.mrb[38].mxu1 %vm1389_vm2, %v2051_v54 }
 0xaa8   : > { %v2052_v58 = vpop.trf.xlu1 }
 0xaa9   : > { %3249 = vmatprep.mubr.msk.f32.mxu1 %vm1389_vm2, %v2052_v58 }
 0xaac   : > { %v2053_v62 = vpop.trf.xlu1 }
 0xaad   : > { %3250 = vmatmul.mubr.msk.f32.gmra.mrb[40].mxu1 %vm1389_vm2, %v2053_v62 }
 0xab0   : > { %v2054_v1 = vpop.trf.xlu1 }
 0xab1   : > { %3252 = vmatprep.mubr.msk.f32.mxu1 %vm1389_vm2, %v2054_v1 }
 0xab4   : > { %v2055_v3 = vpop.trf.xlu1 }
 0xab5   : > { %3253 = vmatmul.mubr.msk.f32.gmra.mrb[42].mxu1 %vm1389_vm2, %v2055_v3 }
 0xab8   : > { %v2056_v5 = vpop.trf.xlu1 }
 0xab9   : > { %3255 = vmatprep.mubr.msk.f32.mxu1 %vm1389_vm2, %v2056_v5 }
 0xabc   : > { %v2057_v63 = vpop.trf.xlu1 }
 0xabd   : > { %3256 = vmatmul.mubr.msk.f32.gmra.mrb[44].mxu1 %vm1389_vm2, %v2057_v63 }
 0xabe   : > { %3290 = vmatprep.mubr.msk.f32.mxu1 %vm4009_vm3, %v4007_v60 }
 0xb43   : > { %v1982_v2 = vpop.f32.mrb[28].mxu1 }
 0xb44   : > { %v4782_v7 = vadd.f32 %v1982_v2, %v4493_v28  ;;  %v3231_v9 = vpop.f32.mrb[29].mxu1 }
 0xb58   : > { %v3236_v12 = vpop.f32.mrb[30].mxu1 }
 0xb59   : > { %v2252_v14 = vmul.f32 0.35355338, %v3236_v12  ;;  %v2172_v16 = vpop.f32.mrb[31].mxu1 }
 0xb5a   : > { %v2251_v6 = vmul.f32 0.35355338, %v2172_v16 }
 0xb5b   : > { %2269 = vmax.xlane.f32.xlu0 %v2252_v14 }
 0xb5f   : > { %2267 = vmax.xlane.f32.xlu0 %v2251_v6 }
 0xb60   : > { %v3239_v10 = vpop.f32.mrb[32].mxu1 }
 0xb61   : > { %v2254_v11 = vmul.f32 0.35355338, %v3239_v10  ;;  %v2182_v17 = vpop.f32.mrb[33].mxu1 }
 0xb62   : > { %v2253_v20 = vmul.f32 0.35355338, %v2182_v17 }
 0xb63   : > { %2273 = vmax.xlane.f32.xlu0 %v2254_v11 }
 0xb67   : > { %2271 = vmax.xlane.f32.xlu0 %v2253_v20 }
 0xb68   : > { %v3242_v21 = vpop.f32.mrb[34].mxu1 }
 0xb69   : > { %v2256_v22 = vmul.f32 0.35355338, %v3242_v21  ;;  %v2192_v27 = vpop.f32.mrb[35].mxu1 }
 0xb6a   : > { %v2255_v23 = vmul.f32 0.35355338, %v2192_v27 }
 0xb6b   : > { %2277 = vmax.xlane.f32.xlu0 %v2256_v22 }
 0xb6f   : > { %2275 = vmax.xlane.f32.xlu0 %v2255_v23 }
 0xb70   : > { %v3245_v28 = vpop.f32.mrb[36].mxu1 }
 0xb71   : > { %v2202_v24 = vpop.f32.mrb[37].mxu1  ;;  %v4787_v32 = vmul.f32 0.35355338, %v3245_v28 }
 0xb72   : > { %v4784_v13 = vmul.f32 0.35355338, %v2202_v24 }
 0xb74   : > { %2279 = vmax.xlane.f32.xlu0 %v4784_v13 }
 0xb78   : > { %2281 = vmax.xlane.f32.xlu0 %v4787_v32  ;;  %v3248_v31 = vpop.f32.mrb[38].mxu1 }
 0xb79   : > { %v4790_v35 = vmul.f32 0.35355338, %v3248_v31  ;;  %v2212_v19 = vpop.f32.mrb[39].mxu1 }
 0xb7a   : > { %v4792_v40 = vmul.f32 0.35355338, %v2212_v19 }
 0xb7b   : > { %2285 = vmax.xlane.f32.xlu1 %v4790_v35 }
 0xb7c   : > { %2283 = vmax.xlane.f32.xlu0 %v4792_v40 }
 0xb80   : > { %v3251_v43 = vpop.f32.mrb[40].mxu1 }
 0xb81   : > { %v4796_v51 = vmul.f32 0.35355338, %v3251_v43  ;;  %v2222_v55 = vpop.f32.mrb[41].mxu1 }
 0xb82   : > { %v4799_v59 = vmul.f32 0.35355338, %v2222_v55 }
 0xb83   : > { %2289 = vmax.xlane.f32.xlu0 %v4796_v51 }
 0xb87   : > { %2287 = vmax.xlane.f32.xlu0 %v4799_v59 }
 0xb88   : > { %v3254_v0 = vpop.f32.mrb[42].mxu1 }
 0xb89   : > { %v4802_v4 = vmul.f32 0.35355338, %v3254_v0  ;;  %v2232_v26 = vpop.f32.mrb[43].mxu1 }
 0xb8a   : > { %v4805_v15 = vmul.f32 0.35355338, %v2232_v26 }
 0xb8b   : > { %2293 = vmax.xlane.f32.xlu0 %v4802_v4 }
 0xb8f   : > { %2291 = vmax.xlane.f32.xlu0 %v4805_v15 }
 0xb90   : > { %v3257_v36 = vpop.f32.mrb[44].mxu1 }
 0xb91   : > { %v2242_v37 = vpop.f32.mrb[45].mxu1  ;;  %v4810_v39 = vmul.f32 0.35355338, %v3257_v36 }
 0xb92   : > { %v4808_v42 = vmul.f32 0.35355338, %v2242_v37 }
 0xb94   : > { %2295 = vmax.xlane.f32.xlu0 %v4808_v42 }
 0xb98   : > { %2297 = vmax.xlane.f32.xlu0 %v4810_v39 }
 0xbe8   : > { %v2270_v38 = vpop.xlane.xlu0 %2269 }
 0xbe9   : > { %v2300_v41 = vsub.f32 %v2252_v14, %v2270_v38 }
 0xbeb   : > { %v2317_v44 = vmul.f32 1.442695, %v2300_v41 }
 0xbec   : > { %v2268_v48 = vpop.xlane.xlu0 %2267 }
 0xbed   : > { %3670 = vpow2.f32 %v2317_v44  ;;  %v2299_v29 = vsub.f32 %v2251_v6, %v2268_v48 }
 0xbef   : > { %v2315_v50 = vmul.f32 1.442695, %v2299_v29 }
 0xbf0   : > { %v2274_v49 = vpop.xlane.xlu0 %2273 }
 0xbf1   : > { %3672 = vpow2.f32 %v2315_v50  ;;  %v2302_v46 = vsub.f32 %v2254_v11, %v2274_v49 }
 0xbf3   : > { %v2321_v52 = vmul.f32 1.442695, %v2302_v46 }
 0xbf4   : > { %v2272_v53 = vpop.xlane.xlu0 %2271 }
 0xbf5   : > { %3674 = vpow2.f32 %v2321_v52  ;;  %v2301_v56 = vsub.f32 %v2253_v20, %v2272_v53 }
 0xbf7   : > { %v4814_v33 = vpop.eup %3670  ;;  %v2319_v57 = vmul.f32 1.442695, %v2301_v56 }
 0xbf8   : > { %v2278_v61 = vpop.xlane.xlu0 %2277  ;;  %2349 = vadd.xlane.f32.xlu0 %v4814_v33 }
 0xbf9   : > { %3676 = vpow2.f32 %v2319_v57  ;;  %v2304_v54 = vsub.f32 %v2256_v22, %v2278_v61 }
 0xbfb   : > { %v4817_v58 = vpop.eup %3672  ;;  %v2325_v62 = vmul.f32 1.442695, %v2304_v54 }
 0xbfc   : > { %v2276_v1 = vpop.xlane.xlu0 %2275  ;;  %2347 = vadd.xlane.f32.xlu0 %v4817_v58 }
 0xbfd   : > { %3678 = vpow2.f32 %v2325_v62  ;;  %v2303_v3 = vsub.f32 %v2255_v23, %v2276_v1 }
 0xbff   : > { %v4820_v5 = vpop.eup %3674  ;;  %v2323_v63 = vmul.f32 1.442695, %v2303_v3 }
 0xc00   : > { %2353 = vadd.xlane.f32.xlu0 %v4820_v5 }
 0xc01   : > { %3680 = vpow2.f32 %v2323_v63  ;;  %v2280_v2 = vpop.xlane.xlu0 %2279 }
 0xc02   : > { %v2305_v14 = vsub.f32 %v4784_v13, %v2280_v2 }
 0xc03   : > { %v4823_v9 = vpop.eup %3676 }
 0xc04   : > { %2351 = vadd.xlane.f32.xlu0 %v4823_v9  ;;  %v2327_v17 = vmul.f32 1.442695, %v2305_v14 }
 0xc05   : > { %v2282_v12 = vpop.xlane.xlu0 %2281 }
 0xc06   : > { %v2306_v16 = vsub.f32 %v4787_v32, %v2282_v12 }
 0xc07   : > { %v4828_v6 = vpop.eup %3678 }
 0xc08   : > { %v2329_v10 = vmul.f32 1.442695, %v2306_v16  ;;  %v2286_v11 = vpop.xlane.xlu1 %2285  ;;  %2357 = vadd.xlane.f32.xlu0 %v4828_v6 }
 0xc09   : > { %v2308_v20 = vsub.f32 %v4790_v35, %v2286_v11  ;;  %v2284_v22 = vpop.xlane.xlu0 %2283 }
 0xc0a   : > { %3682 = vpow2.f32 %v2329_v10  ;;  %v2307_v23 = vsub.f32 %v4792_v40, %v2284_v22 }
 0xc0b   : > { %v4832_v21 = vpop.eup %3680  ;;  %3684 = vpow2.f32 %v2327_v17  ;;  %v2333_v27 = vmul.f32 1.442695, %v2308_v20 }
 0xc0c   : > { %2355 = vadd.xlane.f32.xlu0 %v4832_v21  ;;  %v2331_v24 = vmul.f32 1.442695, %v2307_v23 }
 0xc0d   : > { %3686 = vpow2.f32 %v2333_v27 }
 0xc0e   : > { %3688 = vpow2.f32 %v2331_v24 }
 0xc10   : > { %v2290_v28 = vpop.xlane.xlu0 %2289 }
 0xc11   : > { %v2310_v13 = vsub.f32 %v4796_v51, %v2290_v28 }
 0xc13   : > { %v2337_v35 = vmul.f32 1.442695, %v2310_v13 }
 0xc14   : > { %v4837_v32 = vpop.eup %3682  ;;  %v2288_v31 = vpop.xlane.xlu0 %2287 }
 0xc15   : > { %2361 = vadd.xlane.f32.xlu0 %v4837_v32  ;;  %v2309_v19 = vsub.f32 %v4799_v59, %v2288_v31  ;;  %v4841_v43 = vpop.eup %3684  ;;  %3690 = vpow2.f32 %v2337_v35 }
 0xc17   : > { %v2335_v40 = vmul.f32 1.442695, %v2309_v19  ;;  %v4845_v26 = vpop.eup %3686 }
 0xc18   : > { %v2294_v55 = vpop.xlane.xlu0 %2293  ;;  %v4849_v38 = vpop.eup %3688 }
 0xc19   : > { %2359 = vadd.xlane.f32.xlu0 %v4841_v43  ;;  %v2312_v0 = vsub.f32 %v4802_v4, %v2294_v55  ;;  %3692 = vpow2.f32 %v2335_v40 }
 0xc1b   : > { %v2341_v36 = vmul.f32 1.442695, %v2312_v0 }
 0xc1c   : > { %v2292_v51 = vpop.xlane.xlu0 %2291 }
 0xc1d   : > { %2365 = vadd.xlane.f32.xlu0 %v4845_v26  ;;  %v2311_v37 = vsub.f32 %v4805_v15, %v2292_v51  ;;  %3694 = vpow2.f32 %v2341_v36 }
 0xc1f   : > { %v2339_v41 = vmul.f32 1.442695, %v2311_v37  ;;  %v4853_v48 = vpop.eup %3690 }
 0xc21   : > { %2363 = vadd.xlane.f32.xlu0 %v4849_v38  ;;  %v2296_v59 = vpop.xlane.xlu0 %2295  ;;  %3696 = vpow2.f32 %v2339_v41 }
 0xc22   : > { %v2313_v44 = vsub.f32 %v4808_v42, %v2296_v59 }
 0xc23   : > { %v4857_v49 = vpop.eup %3692 }
 0xc24   : > { %v2343_v29 = vmul.f32 1.442695, %v2313_v44 }
 0xc25   : > { %2369 = vadd.xlane.f32.xlu0 %v4853_v48  ;;  %v2298_v4 = vpop.xlane.xlu0 %2297 }
 0xc26   : > { %v2314_v50 = vsub.f32 %v4810_v39, %v2298_v4  ;;  %3698 = vpow2.f32 %v2343_v29 }
 0xc27   : > { %v4860_v46 = vpop.eup %3694 }
 0xc28   : > { %v2345_v15 = vmul.f32 1.442695, %v2314_v50 }
 0xc29   : > { %2367 = vadd.xlane.f32.xlu0 %v4857_v49 }
 0xc2a   : > { %3700 = vpow2.f32 %v2345_v15 }
 0xc2b   : > { %v4863_v42 = vpop.eup %3696 }
 0xc2d   : > { %2373 = vadd.xlane.f32.xlu0 %v4860_v46 }
 0xc30   : > { %v4866_v52 = vpop.eup %3698 }
 0xc31   : > { %2371 = vadd.xlane.f32.xlu0 %v4863_v42 }
 0xc34   : > { %v4869_v39 = vpop.eup %3700 }
 0xc35   : > { %2375 = vadd.xlane.f32.xlu0 %v4866_v52 }
 0xc39   : > { %2377 = vadd.xlane.f32.xlu0 %v4869_v39 }
 0xc85   : > { %v2350_v53 = vpop.xlane.xlu0 %2349 }
 0xc86   : > { %3702 = vrcp.f32 %v2350_v53 }
 0xc89   : > { %v2348_v56 = vpop.xlane.xlu0 %2347 }
 0xc8a   : > { %3704 = vrcp.f32 %v2348_v56 }
 0xc8d   : > { %v2354_v57 = vpop.xlane.xlu0 %2353 }
 0xc8e   : > { %3706 = vrcp.f32 %v2354_v57 }
 0xc90   : > { %v3703_v54 = vpop.eup %3702 }
 0xc91   : > { %v2352_v61 = vpop.xlane.xlu0 %2351  ;;  %v2396_v63 = vmul.f32 %v3703_v54, %v4814_v33 }
 0xc92   : > { %3708 = vrcp.f32 %v2352_v61 }
 0xc94   : > { %v3705_v62 = vpop.eup %3704 }
 0xc95   : > { %v2358_v1 = vpop.xlane.xlu0 %2357  ;;  %v2395_v3 = vmul.f32 %v3705_v62, %v4817_v58 }
 0xc96   : > { %3710 = vrcp.f32 %v2358_v1 }
 0xc97   : > { %v3442_v2 = vpack.c.bf16 %v2396_v63, %v2395_v3 }
 0xc98   : > { %v3707_v14 = vpop.eup %3706 }
 0xc99   : > { %3443 = vmatpush3.bf16.xpose.msra.mxu1 %v3442_v2  ;;  %v2356_v12 = vpop.xlane.xlu0 %2355  ;;  %v2398_v11 = vmul.f32 %v3707_v14, %v4820_v5 }
 0xc9a   : > { %3712 = vrcp.f32 %v2356_v12  ;;  %3444 = vmatprep.subr.bf16.mxu1 %v4008_v8 }
 0xc9c   : > { %v3709_v16 = vpop.eup %3708 }
 0xc9d   : > { %v2397_v10 = vmul.f32 %v3709_v16, %v4823_v9 }
 0xc9f   : > { %v3445_v17 = vpack.c.bf16 %v2398_v11, %v2397_v10 }
 0xca0   : > { %v3711_v20 = vpop.eup %3710 }
 0xca1   : > { %3446 = vmatpush3.bf16.xpose.msra.mxu1 %v3445_v17  ;;  %v2400_v27 = vmul.f32 %v3711_v20, %v4828_v6 }
 0xca2   : > { %v2362_v22 = vpop.xlane.xlu0 %2361  ;;  %3447 = vmatprep.subr.bf16.mxu1 %v4008_v8 }
 0xca3   : > { %3714 = vrcp.f32 %v2362_v22 }
 0xca4   : > { %v3713_v33 = vpop.eup %3712 }
 0xca5   : > { %v2399_v58 = vmul.f32 %v3713_v33, %v4832_v21 }
 0xca6   : > { %v2360_v23 = vpop.xlane.xlu0 %2359 }
 0xca7   : > { %3716 = vrcp.f32 %v2360_v23  ;;  %v3448_v28 = vpack.c.bf16 %v2400_v27, %v2399_v58 }
 0xca9   : > { %3449 = vmatpush3.bf16.xpose.msra.mxu1 %v3448_v28 }
 0xcaa   : > { %v2366_v24 = vpop.xlane.xlu0 %2365  ;;  %3450 = vmatprep.subr.bf16.mxu1 %v4008_v8 }
 0xcab   : > { %3718 = vrcp.f32 %v2366_v24 }
 0xcad   : > { %v3715_v9 = vpop.eup %3714 }
 0xcae   : > { %v2364_v5 = vpop.xlane.xlu0 %2363  ;;  %v2402_v19 = vmul.f32 %v3715_v9, %v4837_v32 }
 0xcaf   : > { %3720 = vrcp.f32 %v2364_v5 }
 0xcb1   : > { %v3717_v13 = vpop.eup %3716 }
 0xcb2   : > { %v2370_v31 = vpop.xlane.xlu0 %2369  ;;  %v2401_v35 = vmul.f32 %v3717_v13, %v4841_v43 }
 0xcb3   : > { %3722 = vrcp.f32 %v2370_v31  ;;  %v2908_v31 = vld [vmem:[%s5052_s21] ss:$0 sm:$0xff] }
 0xcb4   : > { %v3451_v21 = vpack.c.bf16 %v2402_v19, %v2401_v35  ;;  %v2909_v19 = vld [vmem:[%s5053_s9] ss:$0 sm:$0xff] }
 0xcb5   : > { %v3719_v55 = vpop.eup %3718 }
 0xcb6   : > { %3452 = vmatpush3.bf16.xpose.msra.mxu1 %v3451_v21  ;;  %v2368_v6 = vpop.xlane.xlu0 %2367  ;;  %v2404_v36 = vmul.f32 %v3719_v55, %v4845_v26 }
 0xcb7   : > { %3724 = vrcp.f32 %v2368_v6  ;;  %3453 = vmatprep.subr.bf16.mxu1 %v4008_v8 }
 0xcb9   : > { %v3721_v40 = vpop.eup %3720 }
 0xcba   : > { %v2374_v0 = vpop.xlane.xlu0 %2373  ;;  %v2403_v51 = vmul.f32 %v3721_v40, %v4849_v38 }
 0xcbb   : > { %3726 = vrcp.f32 %v2374_v0 }
 0xcbc   : > { %v3454_v37 = vpack.c.bf16 %v2404_v36, %v2403_v51 }
 0xcbd   : > { %v3723_v59 = vpop.eup %3722 }
 0xcbe   : > { %3455 = vmatpush3.bf16.xpose.msra.mxu1 %v3454_v37  ;;  %v2372_v43 = vpop.xlane.xlu0 %2371  ;;  %v2406_v4 = vmul.f32 %v3723_v59, %v4853_v48 }
 0xcbf   : > { %3728 = vrcp.f32 %v2372_v43  ;;  %3456 = vmatprep.subr.bf16.mxu1 %v4008_v8 }
 0xcc1   : > { %v3725_v32 = vpop.eup %3724 }
 0xcc2   : > { %v2376_v41 = vpop.xlane.xlu0 %2375  ;;  %v2405_v44 = vmul.f32 %v3725_v32, %v4857_v49 }
 0xcc3   : > { %3730 = vrcp.f32 %v2376_v41 }
 0xcc4   : > { %v3457_v29 = vpack.c.bf16 %v2406_v4, %v2405_v44 }
 0xcc5   : > { %v3727_v50 = vpop.eup %3726 }
 0xcc6   : > { %3458 = vmatpush3.bf16.xpose.msra.mxu1 %v3457_v29  ;;  %v2378_v38 = vpop.xlane.xlu0 %2377  ;;  %v2408_v53 = vmul.f32 %v3727_v50, %v4860_v46 }
 0xcc7   : > { %3732 = vrcp.f32 %v2378_v38  ;;  %3459 = vmatprep.subr.bf16.mxu1 %v4008_v8 }
 0xcc9   : > { %v3729_v26 = vpop.eup %3728 }
 0xcca   : > { %v2407_v15 = vmul.f32 %v3729_v26, %v4863_v42  ;;  %v3740_v42 = vld [vmem:[%s4379_s22 + $0x8] sm:$0xff] }
 0xccc   : > { %v3460_v56 = vpack.c.bf16 %v2408_v53, %v2407_v15 }
 0xccd   : > { %v3731_v57 = vpop.eup %3730 }
 0xcce   : > { %3461 = vmatpush3.bf16.xpose.msra.mxu1 %v3460_v56  ;;  %v2409_v49 = vmul.f32 %v3731_v57, %v4866_v52 }
 0xccf   : > { %3462 = vmatprep.subr.bf16.mxu1 %v4008_v8 }
 0xcd1   : > { %v3733_v48 = vpop.eup %3732 }
 0xcd2   : > { %v2410_v61 = vmul.f32 %v3733_v48, %v4869_v39 }
 0xcd4   : > { %v3463_v54 = vpack.c.bf16 %v2410_v61, %v2409_v49 }
 0xcd6   : > { %3464 = vmatpush3.bf16.xpose.msra.mxu1 %v3463_v54 }
 0xcdd   : > { %3291 = vmatmul.mubr.f32.vlgmr.msra.gmra.mrb[46].mxu1 %v4503_v34  ;;  %v2907_v34 = vld [vmem:[%s5051_s29] ss:$0 sm:$0xff]  ;;  %s3919_s29 = scalar_lea.vmem %s3918_s13, 512 }
 0xcde   : > { %v1994_v2 = vadd.f32 %v2907_v34, %v4782_v7  ;;  %p3921_p5 = scmp.lt.s32.totalorder %s3919_s29, %s3913_s14 }
 0xce0   : > { %p3922_p9 = por %p3921_p5, %p3920_p3 }
 0xce2   : > { %p3923_p8 = pnand %p3922_p9, %p3916_p6 }
 0xdb0   : > { %v2477_v62 = vpop.f32.mrb[46].mxu1 }
 0xdb1   : > { %v3292_v1 = vpop.f32.mrb[47].mxu1  ;;  %3326 = vmatmul.mubr.f32.vlgmr.msra.gmra.mrb[6].mxu0 %v2477_v62 }
 0xdb2   : > { %3491 = vmatpush3.bf16.msra.mxu0 %v4734_v18  ;;  %3336 = vmatprep.mubr.msk.f32.mxu0 %vm4009_vm3, %v4007_v60 }
 0xdb3   : > { %3492 = vmatprep.subr.bf16.mxu0 %v4008_v8  ;;  %v1995_v8 = vmax.f32 %v1994_v2, 0.0 }
 0xdb5   : > { %v1998_v14 = vsel %vm848_vm1, %v1995_v8, 0.0 }
 0xdb6   : > { %3494 = vmatpush3.bf16.msra.mxu0 %v4737_v47 }
 0xe84   : > { %v2547_v46 = vpop.f32.mrb[6].mxu0 }
 0xe85   : > { %v2551_v52 = vadd.f32 %v3740_v42, %v2547_v46  ;;  %v3327_v39 = vpop.f32.mrb[7].mxu0 }
 0xe87   : > { %v2554_v3 = vsel %vm848_vm1, %v2551_v52, 0.0 }
 0xe88   : > { %2555 = vadd.xlane.f32.xlu0 %v2554_v3 }
 0xf15   : > { %v2556_v63 = vpop.xlane.xlu0 %2555 }
 0xf16   : > { %v2557_v18 = vmul.f32 0.03125, %v2556_v63 }
 0xf18   : > { %v2558_v60 = vsub.f32 %v2551_v52, %v2557_v18 }
 0xf1a   : > { %v2559_v12 = vmul.f32 %v2558_v60, %v2558_v60 }
 0xf1c   : > { %v2560_v47 = vsel %vm848_vm1, %v2559_v12, 0.0 }
 0xf1d   : > { %2561 = vadd.xlane.f32.xlu0 %v2560_v47 }
 0xf21   : > { %1999 = vadd.xlane.f32.xlu0 %v1998_v14 }
 0xfaa   : > { %v2562_v16 = vpop.xlane.xlu0 %2561 }
 0xfab   : > { %v2563_v10 = vmul.f32 0.03125, %v2562_v16 }
 0xfad   : > { %v2564_v11 = vadd.f32 1e-05, %v2563_v10 }
 0xfae   : > { %v2000_v17 = vpop.xlane.xlu0 %1999 }
 0xfaf   : > { %3734 = vrsqrt.f32 %v2564_v11  ;;  %v2001_v20 = vmul.f32 0.03125, %v2000_v17 }
 0xfb1   : > { %v2002_v22 = vsub.f32 %v1995_v8, %v2001_v20 }
 0xfb3   : > { %v2003_v33 = vmul.f32 %v2002_v22, %v2002_v22 }
 0xfb5   : > { %v2004_v58 = vsel %vm848_vm1, %v2003_v33, 0.0 }
 0xfb6   : > { %2005 = vadd.xlane.f32.xlu0 %v2004_v58 }
 0xfb9   : > { %v3735_v7 = vpop.eup %3734 }
 0xfba   : > { %v2566_v27 = vmul.f32 %v3735_v7, %v2558_v60 }
 0xfbc   : > { %v2573_v23 = vmul.f32 %v4751_v25, %v2566_v27 }
 0xfbe   : > { %v2580_v28 = vadd.f32 %v4756_v45, %v2573_v23 }
 0xfc0   : > { %3337 = vmatmul.mubr.msk.f32.vlgmr.msra.gmra.mrb[8].mxu0 %vm848_vm1, %v2580_v28 }
0x1043   : > { %v2006_v24 = vpop.xlane.xlu0 %2005 }
0x1044   : > { %v2007_v5 = vmul.f32 0.03125, %v2006_v24 }
0x1046   : > { %v2008_v9 = vadd.f32 1e-05, %v2007_v5 }
0x1048   : > { %3736 = vrsqrt.f32 %v2008_v9 }
0x1052   : > { %v3737_v13 = vpop.eup %3736 }
0x1053   : > { %v2010_v35 = vmul.f32 %v3737_v13, %v2002_v22 }
0x1055   : > { %v2017_v21 = vmul.f32 %v2908_v31, %v2010_v35 }
0x1057   : > { %v2024_v25 = vadd.f32 %v2909_v19, %v2017_v21 }
0x1059   : > { %2025 = vst.msk [vmem:[%s664_s18] sm:$0xff] %vm848_vm1, %v2024_v25 }
0x1093   : > { %v2650_v45 = vpop.f32.mrb[8].mxu0 }
0x1094   : > { %v2654_v6 = vadd.f32 %v2650_v45, %v4497_v30  ;;  %v3338_v55 = vpop.f32.mrb[9].mxu0 }
0x1096   : > { %v2662_v40 = vadd.f32 %v2907_v34, %v2654_v6 }
0x1098   : > { %v2663_v0 = vmax.f32 %v2662_v40, 0.0 }
0x109a   : > { %v2666_v51 = vsel %vm848_vm1, %v2663_v0, 0.0 }
0x109b   : > { %2667 = vadd.xlane.f32.xlu1 %v2666_v51 }
0x1128   : > { %v2668_v36 = vpop.xlane.xlu1 %2667 }
0x1129   : > { %v2669_v37 = vmul.f32 0.03125, %v2668_v36 }
0x112b   : > { %v2670_v43 = vsub.f32 %v2663_v0, %v2669_v37 }
0x112d   : > { %v2671_v59 = vmul.f32 %v2670_v43, %v2670_v43 }
0x112f   : > { %v2672_v32 = vsel %vm848_vm1, %v2671_v59, 0.0 }
0x1130   : > { %2673 = vadd.xlane.f32.xlu1 %v2672_v32 }
0x11bd   : > { %v2674_v41 = vpop.xlane.xlu1 %2673 }
0x11be   : > { %v2675_v44 = vmul.f32 0.03125, %v2674_v41 }
0x11c0   : > { %v2676_v4 = vadd.f32 1e-05, %v2675_v44 }
0x11c2   : > { %3738 = vrsqrt.f32 %v2676_v4 }
0x11cc   : > { %v3739_v30 = vpop.eup %3738 }
0x11cd   : > { %v2678_v29 = vmul.f32 %v3739_v30, %v2670_v43 }
0x11cf   : > { %v2685_v38 = vmul.f32 %v2908_v31, %v2678_v29 }
0x11d1   : > { %v2692_v50 = vadd.f32 %v2909_v19, %v2685_v38 }
0x11d3   : > { %2693 = vst.msk [vmem:[%s664_s18 + $0x8] sm:$0xff] %vm848_vm1, %v2692_v50 }
0x11d4   : > { %3926 = shalt.err (!%p3923_p8)
}
0x11d5   : > { %s3927_s22 = scalar_lea.hbm %s4928_s19, 256  ;;  %s3931_s20 = scalar_lea.hbm %s5054_s30, 512 }
0x11d6   : > { %p3928_p11 = scmp.ne.s32.totalorder %s4928_s19, %s3927_s22  ;;  %p3932_p1 = scmp.lt.u32.totalorder %s4928_s19, %s5054_s30 }
0x11d7   : > { %p3933_p2 = scmp.lt.u32.totalorder %s3931_s20, %s3927_s22  ;;  %p3935_p0 = scmp.lt.u32.totalorder %s3927_s22, %s4928_s19 }
0x11d8   : > { %p3929_p7 = pnand %p3928_p11, %p4271_p10 }
0x11d9   : > { %p3934_p13 = por %p3933_p2, %p3932_p1 }
0x11da   : > { %p3930_p12 = pneg %p3929_p7 }
0x11db   : > { %p3936_p4 = por %p3935_p0, %p3934_p13 }
0x11dd   : > { %p3937_p6 = pnand %p3936_p4, %p3930_p12 }
0x11df   : > { %3940 = shalt.err (!%p3937_p6)
}
0x11e0   : > { %s4011_s18 = smov 128   ;;  %s4012_s2 = smov 8  }
0x11e1   : > { %3519 = dma.vmem_to_hbm [thread:$0]  (%p4271_p10), %s4930_s10, 256, %s4928_s19, %s2695_s26, %s4011_s18, %s4011_s18, %s4012_s2  }
0x11e2 PF: > { %s5055_s23 = sld [smem:[#allocation20_spill]]  ;;  %s5056_s17 = sld [smem:[#allocation22_spill]] }
0x11e3   : > { %p5058_p5 = scmp.ge.s32.totalorder %s3995_s27, 2 }
0x11e8   : > { %s2723_s14 = sand.u32 1, %s5055_s23   ;;  %p5057_p3 = scmp.ne.s32.totalorder %s5056_s17, 0 }
0x11e9   : > { %s2724_s28 = scalar_lea.sflag [#allocation4], %s2723_s14 }
0x11ea   : > { %p3542_p9 = pnand %p5058_p5, %p5057_p3 }
0x11ec   : > { %3978 = dma.done.wait (!%p3542_p9), %s2724_s28, 256  }
0x11ed   : > { %3980 = vsyncadd (!%p3542_p9), %s2724_s28, 4294967040  ;;  %s5059_s13 = sld [smem:[#allocation21_spill]]  ;;  %s5060_s26 = sld [smem:[#allocation23_spill]] }
0x11ee   : > { %p35_p8 = scmp.ge.s32.totalorder %s4261_s15, 4   ;;  %s5061_s24 = smov %s3987_s25 }
0x11ef   : > { %s5063_s27 = smov %s4261_s15 }
0x11f0   :  { %37 = sbr.rel (!%p35_p8) target bundleno = 23 (0x17), region = 164 }
0x11f3   : > { %s5062_s25 = smov %s5059_s13 }
0x11f7   :  { %2729 = vsyncpa [#allocation3], 1 }
0x11f8   :  { %2731 = vsyncpa [#allocation3 + $0x1], 1 }
0x11f9   :  { %2732 = vsyncpa [#allocation6], 1 }
0x11fa   :  { %2734 = vsyncpa [#allocation6 + $0x1], 1 }
0x11fb   :  { %2735 = vsyncpa [#allocation9], 1 }
0x11fc   :  { %2736 = vsyncpa [#allocation12], 1 }
0x11fd   :  { %2737 = vsyncpa [#allocation4], 1 }
0x11fe   :  { %2739 = vsyncpa [#allocation4 + $0x1], 1 }

</bundles_post_ra>
